<compile_context>
chip_gen: v7x
topology: tpu7x:2x2x1
jax: 0.10.0
libtpu: 0.0.40
codegen_flags: <defaults>
</compile_context>

<pallas_src>
import functools

import jax
import jax.numpy as jnp
from jax.experimental import pallas as pl
from jax.experimental.pallas import tpu as pltpu

IN_PLANES = 256      # stands in for resnet50's 2048 at small demo scale
NUM_CLASSES = 16     # stands in for the real ~751 identities
BN_EPS = 1e-5
LANE = 128


def _pick_tile(n, preferred, align):
    """Largest divisor of n that is <= preferred and a multiple of `align`.

    Falls back to the full extent n (always a legal block size)."""
    for t in range(min(preferred, n), 0, -1):
        if n % t == 0 and t % align == 0:
            return t
    return n


def _gap_tiles(B, C, HW, itemsize, budget_bytes=20 * 1024 * 1024):
    """Tile sizes for the (B, C, HW) GAP kernel.

    HW sits on the 128-lane axis (full extent when it fits, so the reduction
    grid axis collapses to one step); C sits on sublanes (dtype-dependent
    alignment); tb keeps >=2 blocks along B when possible (v7x megacore)."""
    sub_align = 16 if itemsize == 2 else 8

    # Spatial (lane) axis: take the full extent unless it is enormous.
    ts = HW if HW * itemsize <= (4 << 20) else _pick_tile(HW, (2 << 20) // itemsize, 128)

    # Batch axis: full B when small (block == full dim is always legal);
    # otherwise an 8-aligned tile that still leaves >=2 blocks for megacore.
    tb = B if B <= 8 else _pick_tile(B, max(8, B // 2), 8)

    # Channel (sublane) axis: as large as fits the double-buffered budget.
    per_c_bytes = 2 * tb * ts * itemsize + 4 * tb   # 2x input buffers + f32 acc
    tc_cap = max(sub_align, budget_bytes // max(per_c_bytes, 1))
    tc = C if tc_cap >= C else _pick_tile(C, int(tc_cap), sub_align)
    return tb, tc, ts


# --------------------------------------------------------------------------
# Stage 1: tiled global average pooling (mem-bound, pipelined over HBM)
# --------------------------------------------------------------------------
def gap_kernel(x_ref, gfeat_ref, acc_ref, *, inv_hw):
    s = pl.program_id(2)

    @pl.when(s == 0)
    def _init():
        acc_ref[...] = jnp.zeros_like(acc_ref)

    # x_ref: (tb, tc, ts) — spatial on the 128-lane axis, channels on sublanes.
    # Cast to f32 only inside the accumulate; the cross-lane reduce runs on the
    # XLU, which has slack in a memory-bound kernel.
    acc_ref[...] += jnp.sum(x_ref[...].astype(jnp.float32), axis=-1)

    @pl.when(s == pl.num_programs(2) - 1)
    def _finalize():
        gfeat_ref[...] = acc_ref[...] * inv_hw


def global_avg_pool(x_bcl):
    """x_bcl: (B, C, H*W) in its native dtype -> (B, C) f32 spatial mean."""
    B, C, HW = x_bcl.shape
    itemsize = jnp.dtype(x_bcl.dtype).itemsize
    tb, tc, ts = _gap_tiles(B, C, HW, itemsize)
    grid = (B // tb, C // tc, HW // ts)

    kernel = functools.partial(gap_kernel, inv_hw=1.0 / HW)
    return pl.pallas_call(
        kernel,
        grid=grid,
        in_specs=[pl.BlockSpec((tb, tc, ts), lambda b, c, s: (b, c, s))],
        out_specs=pl.BlockSpec((tb, tc), lambda b, c, s: (b, c)),
        out_shape=jax.ShapeDtypeStruct((B, C), jnp.float32),
        scratch_shapes=[pltpu.VMEM((tb, tc), jnp.float32)],
        compiler_params=pltpu.CompilerParams(
            dimension_semantics=("parallel", "parallel", "arbitrary"),
            vmem_limit_bytes=32 * 1024 * 1024,
        ),
    )(x_bcl)


# --------------------------------------------------------------------------
# Stage 2: BN-neck (training-mode batch statistics) + classifier matmul
#   Single grid step: BN stats computed exactly once, full-extent blocks,
#   no weight padding / no wrapper slice, bf16 MXU operands with f32 acc.
# --------------------------------------------------------------------------
def bnneck_classifier_kernel(gfeat_ref, gamma_ref, beta_ref, w_ref, score_ref):
    gfeat = gfeat_ref[...]                                         # (B, C) f32

    # BatchNorm1d in training mode: biased batch statistics over the full B.
    # TODO(synk): eval mode would use running_mean/running_var (not provided).
    mu = jnp.mean(gfeat, axis=0, keepdims=True)                    # (1, C)
    var = jnp.mean(jnp.square(gfeat - mu), axis=0, keepdims=True)  # biased var
    inv = jax.lax.rsqrt(var + BN_EPS)
    feat = (gfeat - mu) * (inv * gamma_ref[...]) + beta_ref[...]   # (B, C)

    # classifier: Linear(in_planes, num_classes, bias=False)
    # feat (B, C) . W (NC, C)^T -> (B, NC); bf16 operands, f32 accumulation.
    score_ref[...] = jax.lax.dot_general(
        feat.astype(jnp.bfloat16), w_ref[...],
        dimension_numbers=(((1,), (1,)), ((), ())),
        preferred_element_type=jnp.float32,
    )


def bnneck_classifier(gfeat, gamma2, beta2, w_bf16):
    B, C = gfeat.shape
    NC = w_bf16.shape[0]
    return pl.pallas_call(
        bnneck_classifier_kernel,
        grid=(1,),
        in_specs=[
            pl.BlockSpec((B, C), lambda i: (0, 0)),
            pl.BlockSpec((1, C), lambda i: (0, 0)),
            pl.BlockSpec((1, C), lambda i: (0, 0)),
            pl.BlockSpec((NC, C), lambda i: (0, 0)),
        ],
        out_specs=pl.BlockSpec((B, NC), lambda i: (0, 0)),
        out_shape=jax.ShapeDtypeStruct((B, NC), jnp.float32),
        compiler_params=pltpu.CompilerParams(
            dimension_semantics=("arbitrary",),
        ),
    )(gfeat, gamma2, beta2, w_bf16)


# --------------------------------------------------------------------------
# Wrapper: (cls_score, global_feat) like Backbone.forward in training mode
# --------------------------------------------------------------------------
def prepare_params(bn_gamma, bn_beta, w_cls):
    """One-time parameter prep (kept OUT of the per-forward path)."""
    gamma2 = bn_gamma.reshape(1, -1).astype(jnp.float32)
    beta2 = bn_beta.reshape(1, -1).astype(jnp.float32)
    w_bf16 = w_cls.astype(jnp.bfloat16)          # bf16 weights: half the DMA, MXU-native
    return gamma2, beta2, w_bf16


def backbone_forward(x_nchw, gamma2, beta2, w_bf16):
    B, C, H, W = x_nchw.shape
    # Free reshape (no data movement): the GAP kernel consumes (B, C, HW)
    # directly with HW on the lane axis — no XLA-side transpose.
    x_bcl = x_nchw.reshape(B, C, H * W)

    gfeat = global_avg_pool(x_bcl)                                 # (B, C) f32
    cls_score = bnneck_classifier(gfeat, gamma2, beta2, w_bf16)    # (B, NC) f32
    return cls_score, gfeat


def reference_forward(x_nchw, bn_gamma, bn_beta, w_cls):
    """Plain-JAX f32 reference mirroring the PyTorch semantics."""
    B, C, H, W = x_nchw.shape
    x32 = x_nchw.astype(jnp.float32)
    gfeat = jnp.mean(x32.reshape(B, C, H * W), axis=-1)
    mu = jnp.mean(gfeat, axis=0, keepdims=True)
    var = jnp.mean((gfeat - mu) ** 2, axis=0, keepdims=True)
    feat = (gfeat - mu) / jnp.sqrt(var + BN_EPS) * bn_gamma[None, :] + bn_beta[None, :]
    score = feat @ w_cls.astype(jnp.float32).T
    return score, gfeat


if __name__ == "__main__":
    key = jax.random.PRNGKey(0)
    k_x, k_w = jax.random.split(key)

    B, C, H, W = 2, IN_PLANES, 16, 16
    # Backbone feature maps arrive in bf16 on TPU; the GAP kernel DMAs them
    # natively and accumulates in f32.
    x = jax.random.normal(k_x, (B, C, H, W), dtype=jnp.float32).astype(jnp.bfloat16)

    # Deterministic parameter init mirroring the PyTorch module:
    #   classifier: nn.init.normal_(weight, std=0.001), bias=False
    #   bottleneck (BatchNorm1d): weight=1, bias=0 (weights_init_kaiming)
    w_cls = 0.001 * jax.random.normal(k_w, (NUM_CLASSES, C), dtype=jnp.float32)
    bn_gamma = jnp.ones((C,), dtype=jnp.float32)
    bn_beta = jnp.zeros((C,), dtype=jnp.float32)

    gamma2, beta2, w_bf16 = prepare_params(bn_gamma, bn_beta, w_cls)

    cls_score, global_feat = backbone_forward(x, gamma2, beta2, w_bf16)
    jax.block_until_ready((cls_score, global_feat))

    ref_score, ref_gfeat = reference_forward(x, bn_gamma, bn_beta, w_cls)
    assert cls_score.shape == (B, NUM_CLASSES)
    assert global_feat.shape == (B, C)
    assert jnp.allclose(global_feat, ref_gfeat, atol=1e-4, rtol=1e-5)
    # cls_score uses bf16 MXU operands (f32 accumulation) -> looser tolerance.
    assert jnp.allclose(cls_score, ref_score, atol=1e-3, rtol=1e-2)

    print("KERNEL_OK")
</pallas_src>

<mosaic_0001>
module attributes {stable_mosaic.version = 11 : i64} {
  func.func @gap_kernel(%arg0: i32, %arg1: i32, %arg2: i32, %arg3: memref<2x256x256xbf16, #tpu.memory_space<vmem>>, %arg4: memref<2x256xf32, #tpu.memory_space<vmem>>, %arg5: memref<2x256xf32, #tpu.memory_space<vmem>>) attributes {dimension_semantics = [#tpu.dimension_semantics<parallel>, #tpu.dimension_semantics<parallel>, #tpu.dimension_semantics<arbitrary>], iteration_bounds = array<i64: 1, 1, 1>, scalar_prefetch = 0 : i64, scratch_operands = 1 : i64, tpu.core_type = #tpu.core_type<tc>, window_params = [{transform_indices = @transform_0, window_bounds = array<i64: 2, 256, 256>}, {transform_indices = @transform_1, window_bounds = array<i64: 2, 256>}]} {
    %c0_i32 = arith.constant 0 : i32
    %0 = arith.cmpi eq, %arg2, %c0_i32 : i32
    %1 = arith.extui %0 : i1 to i32
    %c0_i32_0 = arith.constant 0 : i32
    %2 = arith.cmpi ne, %1, %c0_i32_0 : i32
    scf.if %2 {
      %cst_9 = arith.constant 0.000000e+00 : f32
      %12 = vector.broadcast %cst_9 : f32 to vector<2x256xf32>
      %c0_10 = arith.constant 0 : index
      %c0_11 = arith.constant 0 : index
      %13 = vector.load %arg5[%c0_10, %c0_11] : memref<2x256xf32, #tpu.memory_space<vmem>>, vector<2x256xf32>
      tpu.vector_store %arg5[%c0_10, %c0_11], %12 {strides = array<i32>} : memref<2x256xf32, #tpu.memory_space<vmem>>, vector<2x256xf32>,
    } else {
    }
    %c0 = arith.constant 0 : index
    %c0_1 = arith.constant 0 : index
    %3 = vector.load %arg5[%c0, %c0_1] : memref<2x256xf32, #tpu.memory_space<vmem>>, vector<2x256xf32>
    %c0_2 = arith.constant 0 : index
    %c0_3 = arith.constant 0 : index
    %c0_4 = arith.constant 0 : index
    %4 = vector.load %arg3[%c0_2, %c0_3, %c0_4] : memref<2x256x256xbf16, #tpu.memory_space<vmem>>, vector<2x256x256xbf16>
    %5 = arith.extf %4 : vector<2x256x256xbf16> to vector<2x256x256xf32>
    %cst = arith.constant dense<0.000000e+00> : vector<2x256xf32>
    %6 = vector.multi_reduction <add>, %5, %cst [2] : vector<2x256x256xf32> to vector<2x256xf32>
    %7 = arith.addf %3, %6 : vector<2x256xf32>
    %c0_5 = arith.constant 0 : index
    %c0_6 = arith.constant 0 : index
    %8 = vector.load %arg5[%c0_5, %c0_6] : memref<2x256xf32, #tpu.memory_space<vmem>>, vector<2x256xf32>
    tpu.vector_store %arg5[%c0_5, %c0_6], %7 {strides = array<i32>} : memref<2x256xf32, #tpu.memory_space<vmem>>, vector<2x256xf32>,
    %c0_i32_7 = arith.constant 0 : i32
    %9 = arith.cmpi eq, %arg2, %c0_i32_7 : i32
    %10 = arith.extui %9 : i1 to i32
    %c0_i32_8 = arith.constant 0 : i32
    %11 = arith.cmpi ne, %10, %c0_i32_8 : i32
    scf.if %11 {
      %c0_9 = arith.constant 0 : index
      %c0_10 = arith.constant 0 : index
      %12 = vector.load %arg5[%c0_9, %c0_10] : memref<2x256xf32, #tpu.memory_space<vmem>>, vector<2x256xf32>
      %cst_11 = arith.constant 3.906250e-03 : f32
      %13 = vector.broadcast %cst_11 : f32 to vector<2x256xf32>
      %14 = arith.mulf %12, %13 : vector<2x256xf32>
      %c0_12 = arith.constant 0 : index
      %c0_13 = arith.constant 0 : index
      %15 = vector.load %arg4[%c0_12, %c0_13] : memref<2x256xf32, #tpu.memory_space<vmem>>, vector<2x256xf32>
      tpu.vector_store %arg4[%c0_12, %c0_13], %14 {strides = array<i32>} : memref<2x256xf32, #tpu.memory_space<vmem>>, vector<2x256xf32>,
    } else {
    }
    return
  }
  func.func @transform_0(%arg0: i32, %arg1: i32, %arg2: i32) -> (i32, i32, i32) {
    %c0_i32 = arith.constant 0 : i32
    return %arg0, %arg1, %arg2 : i32, i32, i32
  }
  func.func @transform_1(%arg0: i32, %arg1: i32, %arg2: i32) -> (i32, i32) {
    %c0_i32 = arith.constant 0 : i32
    return %arg0, %arg1 : i32, i32
  }
}

</mosaic_0001>

<bundles_post_ra>
// kernel: tpu_custom_call.1
= control target key start
LH: loop header
LB: loop body
LE: loop exit
PB: predicated region body
PF: predicated region fallthrough
CT: control target
= control target key end

     0   :  { %6 = vsyncpa [#allocation4], 0  ;;  %s4935_s0 = inlined_call_operand.hbm [shape: bf16[2,256,256], index: 0, kind: input, shape index: {}]   ;;  %s4936_s1 = inlined_call_operand.hbm [shape: f32[2,256], index: 1, kind: output, shape index: {}]  }
   0x1   :  { %7 = vsyncpa [#allocation5], 0  ;;  %s3993_s6 = smov [#allocation3]   ;;  %s3945_s10 = scalar_lea.hbm %s4935_s0, 8192 }
   0x2   :  { %s13_s7 = sshll.u32 %s3993_s6, 4  ;;  %p3946_p0 = scmp.ne.s32.totalorder %s4935_s0, %s3945_s10  ;;  %s14_s7 = int_to_ptr.vmem [resolvable:$true] %s13_s7 }
   0x3   :  { %p3949_p1 = scmp.lt.u32.totalorder %s3945_s10, %s4935_s0 }
   0x5   :  { %p3951_p2 = pnand %p3949_p1, %p3946_p0 }
   0x7   :  { %3954 = shalt.err (!%p3951_p2)
}
   0x8   :  { %s3955_s15 = scalar_lea.vmem %s14_s7, 8192  ;;  %p3960_p4 = scmp.lt.s32.totalorder %s14_s7, %s14_s7 }
   0x9   :  { %p3956_p3 = scmp.ne.s32.totalorder %s14_s7, %s3955_s15  ;;  %p3961_p5 = scmp.lt.s32.totalorder %s3955_s15, %s3955_s15 }
   0xb   :  { %p3962_p6 = por %p3961_p5, %p3960_p4 }
   0xd   :  { %p3963_p7 = pnand %p3962_p6, %p3956_p3 }
   0xf   :  { %3966 = shalt.err (!%p3963_p7)
}
  0x10   :  { %s3994_s16 = smov 128   ;;  %s3995_s17 = smov 8  }
  0x11   :  { %19 = dma.hbm_to_vmem [thread:$0]  %s4935_s0, 8192, %s14_s7, [#allocation4], %s3994_s16, %s3994_s16, %s3995_s17  }
  0x12   :  { %3989 = dma.done.wait [#allocation4], 8192  }
  0x13   :  { %3990 = vsyncadd [#allocation4], 4294959104  ;;  %v31_v0 = vld [vmem:[#allocation3 + $0x10] sm:$0xff]  ;;  %v29_v1 = vld [vmem:[#allocation3] sm:$0xff]  ;;  %vm3560_vm0 = vcmask 130112   ;;  %vm3567_vm1 = vcmask 195712  }
  0x14   :  { %v32_v2 = vld [vmem:[#allocation3 + $0x18] sm:$0xff]  ;;  %v97_v3 = vunpack.c.l.bf16 %v31_v0  ;;  %v98_v4 = vunpack.c.h.bf16 %v31_v0  ;;  %v93_v5 = vunpack.c.l.bf16 %v29_v1  ;;  %v94_v6 = vunpack.c.h.bf16 %v29_v1  ;;  %v30_v7 = vld [vmem:[#allocation3 + $0x8] sm:$0xff]  ;;  %v33_v13 = vld [vmem:[#allocation3 + $0x20] sm:$0xff]  ;;  %s4003_s0 = smov [#allocation6]  }
  0x15   :  { %v34_v8 = vld [vmem:[#allocation3 + $0x28] sm:$0xff]  ;;  %v99_v9 = vunpack.c.l.bf16 %v32_v2  ;;  %v100_v10 = vunpack.c.h.bf16 %v32_v2  ;;  %v95_v11 = vunpack.c.l.bf16 %v30_v7  ;;  %v96_v12 = vunpack.c.h.bf16 %v30_v7  ;;  %v36_v22 = vld [vmem:[#allocation3 + $0x38] sm:$0xff]  ;;  %v35_v23 = vld [vmem:[#allocation3 + $0x30] sm:$0xff]  ;;  %s3923_s20 = sshll.u32 %s4003_s0, 4  ;;  %s3924_s20 = int_to_ptr.vmem [resolvable:$true] %s3923_s20 }
  0x16   :  { %v227_v14 = vadd.f32 %v98_v4, %v97_v3  ;;  %v221_v15 = vadd.f32 %v94_v6, %v93_v5  ;;  %v103_v16 = vunpack.c.l.bf16 %v34_v8  ;;  %v104_v17 = vunpack.c.h.bf16 %v34_v8  ;;  %v38_v30 = vld [vmem:[#allocation3 + $0x48] sm:$0xff]  ;;  %v37_v31 = vld [vmem:[#allocation3 + $0x40] sm:$0xff]  ;;  %v40_v38 = vld [vmem:[#allocation3 + $0x58] sm:$0xff]  ;;  %s3967_s21 = scalar_lea.vmem %s3924_s20, 64  ;;  %p3972_p9 = scmp.lt.s32.totalorder %s3924_s20, %s3924_s20 }
  0x17   :  { %v230_v18 = vadd.f32 %v100_v10, %v99_v9  ;;  %v224_v19 = vadd.f32 %v96_v12, %v95_v11  ;;  %v101_v20 = vunpack.c.l.bf16 %v33_v13  ;;  %v102_v21 = vunpack.c.h.bf16 %v33_v13  ;;  %v39_v39 = vld [vmem:[#allocation3 + $0x50] sm:$0xff]  ;;  %v42_v46 = vld [vmem:[#allocation3 + $0x68] sm:$0xff]  ;;  %v41_v47 = vld [vmem:[#allocation3 + $0x60] sm:$0xff]  ;;  %p3968_p8 = scmp.ne.s32.totalorder %s3924_s20, %s3967_s21  ;;  %p3973_p10 = scmp.lt.s32.totalorder %s3967_s21, %s3967_s21 }
  0x18   :  { %228 = vadd.xlane.f32.xlu1 %v227_v14  ;;  %222 = vadd.xlane.f32.xlu0 %v221_v15  ;;  %v236_v24 = vadd.f32 %v104_v17, %v103_v16  ;;  %v107_v25 = vunpack.c.l.bf16 %v36_v22  ;;  %v108_v27 = vunpack.c.h.bf16 %v36_v22  ;;  %v105_v28 = vunpack.c.l.bf16 %v35_v23  ;;  %v44_v54 = vld [vmem:[#allocation3 + $0x78] sm:$0xff]  ;;  %v43_v55 = vld [vmem:[#allocation3 + $0x70] sm:$0xff]  ;;  %v46_v62 = vld [vmem:[#allocation3 + $0x88] sm:$0xff] }
  0x19   :  { %v233_v26 = vadd.f32 %v102_v21, %v101_v20  ;;  %v106_v29 = vunpack.c.h.bf16 %v35_v23  ;;  %v111_v32 = vunpack.c.l.bf16 %v38_v30  ;;  %v112_v33 = vunpack.c.h.bf16 %v38_v30  ;;  %v45_v63 = vld [vmem:[#allocation3 + $0x80] sm:$0xff]  ;;  %v48_v6 = vld [vmem:[#allocation3 + $0x98] sm:$0xff]  ;;  %v47_v7 = vld [vmem:[#allocation3 + $0x90] sm:$0xff]  ;;  %p3974_p11 = por %p3973_p10, %p3972_p9 }
  0x1a   :  { %v242_v34 = vadd.f32 %v108_v27, %v107_v25  ;;  %v109_v36 = vunpack.c.l.bf16 %v37_v31  ;;  %v110_v37 = vunpack.c.h.bf16 %v37_v31  ;;  %v115_v41 = vunpack.c.l.bf16 %v40_v38  ;;  %v50_v14 = vld [vmem:[#allocation3 + $0xa8] sm:$0xff]  ;;  %v49_v15 = vld [vmem:[#allocation3 + $0xa0] sm:$0xff]  ;;  %v52_v22 = vld [vmem:[#allocation3 + $0xb8] sm:$0xff] }
  0x1b   :  { %v239_v35 = vadd.f32 %v106_v29, %v105_v28  ;;  %v248_v40 = vadd.f32 %v112_v33, %v111_v32  ;;  %v116_v43 = vunpack.c.h.bf16 %v40_v38  ;;  %v113_v44 = vunpack.c.l.bf16 %v39_v39  ;;  %v51_v23 = vld [vmem:[#allocation3 + $0xb0] sm:$0xff]  ;;  %v54_v30 = vld [vmem:[#allocation3 + $0xc8] sm:$0xff]  ;;  %v53_v31 = vld [vmem:[#allocation3 + $0xc0] sm:$0xff]  ;;  %p3975_p12 = pnand %p3974_p11, %p3968_p8 }
  0x1c   :  { %231 = vadd.xlane.f32.xlu1 %v230_v18  ;;  %225 = vadd.xlane.f32.xlu0 %v224_v19  ;;  %v245_v42 = vadd.f32 %v110_v37, %v109_v36  ;;  %v114_v45 = vunpack.c.h.bf16 %v39_v39  ;;  %v119_v48 = vunpack.c.l.bf16 %v42_v46  ;;  %v120_v49 = vunpack.c.h.bf16 %v42_v46  ;;  %v56_v38 = vld [vmem:[#allocation3 + $0xd8] sm:$0xff]  ;;  %v55_v39 = vld [vmem:[#allocation3 + $0xd0] sm:$0xff]  ;;  %v58_v46 = vld [vmem:[#allocation3 + $0xe8] sm:$0xff] }
  0x1d   :  { %v254_v50 = vadd.f32 %v116_v43, %v115_v41  ;;  %v117_v52 = vunpack.c.l.bf16 %v41_v47  ;;  %v118_v53 = vunpack.c.h.bf16 %v41_v47  ;;  %v123_v57 = vunpack.c.l.bf16 %v44_v54  ;;  %v57_v47 = vld [vmem:[#allocation3 + $0xe0] sm:$0xff] }
  0x1e   :  { %v251_v51 = vadd.f32 %v114_v45, %v113_v44  ;;  %v260_v56 = vadd.f32 %v120_v49, %v119_v48  ;;  %v124_v59 = vunpack.c.h.bf16 %v44_v54  ;;  %v121_v60 = vunpack.c.l.bf16 %v43_v55 }
  0x1f   :  { %v257_v58 = vadd.f32 %v118_v53, %v117_v52  ;;  %v122_v61 = vunpack.c.h.bf16 %v43_v55  ;;  %v127_v0 = vunpack.c.l.bf16 %v46_v62  ;;  %v128_v1 = vunpack.c.h.bf16 %v46_v62  ;;  %v60_v55 = vld [vmem:[#allocation3 + $0xf8] sm:$0xff] }
  0x20   :  { %237 = vadd.xlane.f32.xlu1 %v236_v24  ;;  %234 = vadd.xlane.f32.xlu0 %v233_v26  ;;  %v266_v2 = vadd.f32 %v124_v59, %v123_v57  ;;  %v125_v4 = vunpack.c.l.bf16 %v45_v63  ;;  %v126_v5 = vunpack.c.h.bf16 %v45_v63  ;;  %v131_v9 = vunpack.c.l.bf16 %v48_v6  ;;  %v62_v63 = vld [vmem:[#allocation3 + $0x108] sm:$0xff] }
  0x21   :  { %v263_v3 = vadd.f32 %v122_v61, %v121_v60  ;;  %v272_v8 = vadd.f32 %v128_v1, %v127_v0  ;;  %v132_v11 = vunpack.c.h.bf16 %v48_v6  ;;  %v129_v12 = vunpack.c.l.bf16 %v47_v7  ;;  %v61_v0 = vld [vmem:[#allocation3 + $0x100] sm:$0xff] }
  0x22   :  { %v269_v10 = vadd.f32 %v126_v5, %v125_v4  ;;  %v130_v13 = vunpack.c.h.bf16 %v47_v7  ;;  %v135_v16 = vunpack.c.l.bf16 %v50_v14  ;;  %v136_v17 = vunpack.c.h.bf16 %v50_v14  ;;  %v64_v7 = vld [vmem:[#allocation3 + $0x118] sm:$0xff] }
  0x23   :  { %v278_v18 = vadd.f32 %v132_v11, %v131_v9  ;;  %v133_v20 = vunpack.c.l.bf16 %v49_v15  ;;  %v134_v21 = vunpack.c.h.bf16 %v49_v15  ;;  %v139_v25 = vunpack.c.l.bf16 %v52_v22  ;;  %v66_v15 = vld [vmem:[#allocation3 + $0x128] sm:$0xff] }
  0x24   :  { %243 = vadd.xlane.f32.xlu1 %v242_v34  ;;  %240 = vadd.xlane.f32.xlu0 %v239_v35  ;;  %v275_v19 = vadd.f32 %v130_v13, %v129_v12  ;;  %v284_v24 = vadd.f32 %v136_v17, %v135_v16  ;;  %v140_v27 = vunpack.c.h.bf16 %v52_v22  ;;  %v137_v28 = vunpack.c.l.bf16 %v51_v23  ;;  %v65_v16 = vld [vmem:[#allocation3 + $0x120] sm:$0xff] }
  0x25   :  { %v281_v26 = vadd.f32 %v134_v21, %v133_v20  ;;  %v138_v29 = vunpack.c.h.bf16 %v51_v23  ;;  %v143_v32 = vunpack.c.l.bf16 %v54_v30  ;;  %v144_v33 = vunpack.c.h.bf16 %v54_v30  ;;  %v68_v23 = vld [vmem:[#allocation3 + $0x138] sm:$0xff] }
  0x26   :  { %v290_v34 = vadd.f32 %v140_v27, %v139_v25  ;;  %v141_v36 = vunpack.c.l.bf16 %v53_v31  ;;  %v142_v37 = vunpack.c.h.bf16 %v53_v31  ;;  %v147_v41 = vunpack.c.l.bf16 %v56_v38  ;;  %v70_v31 = vld [vmem:[#allocation3 + $0x148] sm:$0xff] }
  0x27   :  { %v287_v35 = vadd.f32 %v138_v29, %v137_v28  ;;  %v148_v43 = vunpack.c.h.bf16 %v56_v38  ;;  %v145_v44 = vunpack.c.l.bf16 %v55_v39  ;;  %v146_v45 = vunpack.c.h.bf16 %v55_v39  ;;  %v72_v39 = vld [vmem:[#allocation3 + $0x158] sm:$0xff] }
  0x28   :  { %249 = vadd.xlane.f32.xlu1 %v248_v40  ;;  %246 = vadd.xlane.f32.xlu0 %v245_v42  ;;  %v296_v40 = vadd.f32 %v144_v33, %v143_v32  ;;  %v293_v42 = vadd.f32 %v142_v37, %v141_v36  ;;  %v151_v48 = vunpack.c.l.bf16 %v58_v46  ;;  %v152_v49 = vunpack.c.h.bf16 %v58_v46  ;;  %v69_v32 = vld [vmem:[#allocation3 + $0x140] sm:$0xff] }
  0x29   :  { %v299_v52 = vadd.f32 %v146_v45, %v145_v44  ;;  %v149_v53 = vunpack.c.l.bf16 %v57_v47  ;;  %v150_v54 = vunpack.c.h.bf16 %v57_v47  ;;  %v156_v60 = vunpack.c.h.bf16 %v60_v55  ;;  %v74_v47 = vld [vmem:[#allocation3 + $0x168] sm:$0xff] }
  0x2a   :  { %v308_v57 = vadd.f32 %v152_v49, %v151_v48  ;;  %v159_v1 = vunpack.c.l.bf16 %v62_v63  ;;  %v157_v5 = vunpack.c.l.bf16 %v61_v0  ;;  %v158_v6 = vunpack.c.h.bf16 %v61_v0  ;;  %v73_v48 = vld [vmem:[#allocation3 + $0x160] sm:$0xff] }
  0x2b   :  { %v305_v59 = vadd.f32 %v150_v54, %v149_v53  ;;  %v164_v12 = vunpack.c.h.bf16 %v64_v7  ;;  %v167_v17 = vunpack.c.l.bf16 %v66_v15  ;;  %v165_v21 = vunpack.c.l.bf16 %v65_v16  ;;  %v77_v0 = vld [vmem:[#allocation3 + $0x180] sm:$0xff] }
  0x2c   :  { %255 = vadd.xlane.f32.xlu1 %v254_v50  ;;  %252 = vadd.xlane.f32.xlu0 %v251_v51  ;;  %v3996_v50 = vmov 0   ;;  %v302_v51 = vadd.f32 %v148_v43, %v147_v41  ;;  %v317_v11 = vadd.f32 %v158_v6, %v157_v5  ;;  %v166_v22 = vunpack.c.h.bf16 %v65_v16  ;;  %v81_v16 = vld [vmem:[#allocation3 + $0x1a0] sm:$0xff] }
  0x2d   :  { %3943 = vset.pattern.permute.xlu0 %v3996_v50  ;;  %3944 = vset.pattern.permute.xlu1 %v3996_v50  ;;  %v172_v28 = vunpack.c.h.bf16 %v68_v23  ;;  %v175_v33 = vunpack.c.l.bf16 %v70_v31  ;;  %v173_v37 = vunpack.c.l.bf16 %v69_v32  ;;  %v174_v38 = vunpack.c.h.bf16 %v69_v32  ;;  %v86_v32 = vld [vmem:[#allocation3 + $0x1c8] sm:$0xff] }
  0x2e   :  { %v329_v27 = vadd.f32 %v166_v22, %v165_v21  ;;  %v180_v44 = vunpack.c.h.bf16 %v72_v39  ;;  %v183_v49 = vunpack.c.l.bf16 %v74_v47  ;;  %v184_v50 = vunpack.c.h.bf16 %v74_v47 }
  0x2f   :  { %v341_v43 = vadd.f32 %v174_v38, %v173_v37  ;;  %v181_v53 = vunpack.c.l.bf16 %v73_v48  ;;  %v182_v54 = vunpack.c.h.bf16 %v73_v48  ;;  %v189_v5 = vunpack.c.l.bf16 %v77_v0  ;;  %v90_v48 = vld [vmem:[#allocation3 + $0x1e8] sm:$0xff] }
  0x30   :  { %261 = vadd.xlane.f32.xlu1 %v260_v56  ;;  %258 = vadd.xlane.f32.xlu0 %v257_v58  ;;  %v59_v56 = vld [vmem:[#allocation3 + $0xf0] sm:$0xff]  ;;  %v155_v58 = vunpack.c.l.bf16 %v60_v55  ;;  %v76_v55 = vld [vmem:[#allocation3 + $0x178] sm:$0xff]  ;;  %v190_v6 = vunpack.c.h.bf16 %v77_v0  ;;  %v197_v21 = vunpack.c.l.bf16 %v81_v16  ;;  %v198_v22 = vunpack.c.h.bf16 %v81_v16 }
  0x31   :  { %v153_v61 = vunpack.c.l.bf16 %v59_v56  ;;  %v154_v62 = vunpack.c.h.bf16 %v59_v56  ;;  %v75_v56 = vld [vmem:[#allocation3 + $0x170] sm:$0xff]  ;;  %v207_v37 = vunpack.c.l.bf16 %v86_v32  ;;  %v208_v38 = vunpack.c.h.bf16 %v86_v32 }
  0x32   :  { %vm3574_vm2 = vcmask 261312   ;;  %vm3581_vm3 = vcmask 326912   ;;  %vm3588_vm4 = vcmask 392512   ;;  %vm3595_vm5 = vcmask 458112  }
  0x33   :  { %v311_v4 = vadd.f32 %v154_v62, %v153_v61  ;;  %v185_v61 = vunpack.c.l.bf16 %v75_v56  ;;  %v186_v62 = vunpack.c.h.bf16 %v75_v56  ;;  %v92_v56 = vld [vmem:[#allocation3 + $0x1f8] sm:$0xff]  ;;  %vm3602_vm6 = vcmask 523712  }
  0x34   :  { %267 = vadd.xlane.f32.xlu1 %v266_v2  ;;  %264 = vadd.xlane.f32.xlu0 %v263_v3  ;;  %v160_v2 = vunpack.c.h.bf16 %v62_v63  ;;  %v314_v3 = vadd.f32 %v156_v60, %v155_v58  ;;  %v187_v58 = vunpack.c.l.bf16 %v76_v55  ;;  %v188_v60 = vunpack.c.h.bf16 %v76_v55  ;;  %v78_v63 = vld [vmem:[#allocation3 + $0x188] sm:$0xff] }
  0x35   :  { %v216_v55 = vunpack.c.h.bf16 %v90_v48  ;;  %vm3609_vm7 = vcmask 589312   ;;  %vm3616_vm8 = vcmask 654912   ;;  %vm3623_vm9 = vcmask 720512  }
  0x36   :  { %v320_v9 = vadd.f32 %v160_v2, %v159_v1  ;;  %v191_v1 = vunpack.c.l.bf16 %v78_v63  ;;  %v192_v2 = vunpack.c.h.bf16 %v78_v63  ;;  %vm3630_vm10 = vcmask 786112  }
  0x37   :  { %vm3637_vm11 = vcmask 851712   ;;  %vm3644_vm12 = vcmask 917312   ;;  %vm3651_vm13 = vcmask 982912   ;;  %vm3658_vm14 = vcmask 1048512  }
  0x38   :  { %273 = vadd.xlane.f32.xlu1 %v272_v8  ;;  %270 = vadd.xlane.f32.xlu0 %v269_v10  ;;  %v63_v8 = vld [vmem:[#allocation3 + $0x110] sm:$0xff]  ;;  %v163_v10 = vunpack.c.l.bf16 %v64_v7  ;;  %v80_v7 = vld [vmem:[#allocation3 + $0x198] sm:$0xff]  ;;  %vm3897_vm15 = vcmask 1041409  }
  0x39   :  { %v161_v13 = vunpack.c.l.bf16 %v63_v8  ;;  %v162_v14 = vunpack.c.h.bf16 %v63_v8  ;;  %v79_v8 = vld [vmem:[#allocation3 + $0x190] sm:$0xff] }
  0x3b   :  { %v323_v20 = vadd.f32 %v162_v14, %v161_v13  ;;  %v193_v13 = vunpack.c.l.bf16 %v79_v8  ;;  %v194_v14 = vunpack.c.h.bf16 %v79_v8  ;;  %v4000_v8 = vmov 1987475062  }
  0x3c   :  { %279 = vadd.xlane.f32.xlu1 %v278_v18  ;;  %276 = vadd.xlane.f32.xlu0 %v275_v19  ;;  %v168_v18 = vunpack.c.h.bf16 %v66_v15  ;;  %v326_v19 = vadd.f32 %v164_v12, %v163_v10  ;;  %v195_v10 = vunpack.c.l.bf16 %v80_v7  ;;  %v196_v12 = vunpack.c.h.bf16 %v80_v7  ;;  %v82_v15 = vld [vmem:[#allocation3 + $0x1a8] sm:$0xff] }
  0x3e   :  { %v332_v25 = vadd.f32 %v168_v18, %v167_v17  ;;  %v199_v17 = vunpack.c.l.bf16 %v82_v15  ;;  %v200_v18 = vunpack.c.h.bf16 %v82_v15  ;;  %v4001_v15 = vmov 1983009808  }
  0x3f   :  { %v2272_v16 = vunpack.c.l.s4 %v4001_v15 }
  0x40   :  { %285 = vadd.xlane.f32.xlu1 %v284_v24  ;;  %282 = vadd.xlane.f32.xlu0 %v281_v26  ;;  %v67_v24 = vld [vmem:[#allocation3 + $0x130] sm:$0xff]  ;;  %v171_v26 = vunpack.c.l.bf16 %v68_v23 }
  0x41   :  { %v169_v29 = vunpack.c.l.bf16 %v67_v24  ;;  %v170_v30 = vunpack.c.h.bf16 %v67_v24  ;;  %v83_v23 = vld [vmem:[#allocation3 + $0x1b0] sm:$0xff]  ;;  %v84_v24 = vld [vmem:[#allocation3 + $0x1b8] sm:$0xff] }
  0x43   :  { %v335_v36 = vadd.f32 %v170_v30, %v169_v29  ;;  %v203_v29 = vunpack.c.l.bf16 %v84_v24  ;;  %v204_v30 = vunpack.c.h.bf16 %v84_v24 }
  0x44   :  { %291 = vadd.xlane.f32.xlu1 %v290_v34  ;;  %288 = vadd.xlane.f32.xlu0 %v287_v35  ;;  %v176_v34 = vunpack.c.h.bf16 %v70_v31  ;;  %v338_v35 = vadd.f32 %v172_v28, %v171_v26  ;;  %v201_v26 = vunpack.c.l.bf16 %v83_v23  ;;  %v202_v28 = vunpack.c.h.bf16 %v83_v23  ;;  %v85_v31 = vld [vmem:[#allocation3 + $0x1c0] sm:$0xff] }
  0x46   :  { %v344_v41 = vadd.f32 %v176_v34, %v175_v33  ;;  %v205_v33 = vunpack.c.l.bf16 %v85_v31  ;;  %v206_v34 = vunpack.c.h.bf16 %v85_v31 }
  0x48   :  { %297 = vadd.xlane.f32.xlu1 %v296_v40  ;;  %294 = vadd.xlane.f32.xlu0 %v293_v42  ;;  %v71_v40 = vld [vmem:[#allocation3 + $0x150] sm:$0xff]  ;;  %v179_v42 = vunpack.c.l.bf16 %v72_v39 }
  0x49   :  { %v177_v45 = vunpack.c.l.bf16 %v71_v40  ;;  %v178_v46 = vunpack.c.h.bf16 %v71_v40  ;;  %v87_v39 = vld [vmem:[#allocation3 + $0x1d0] sm:$0xff]  ;;  %v88_v40 = vld [vmem:[#allocation3 + $0x1d8] sm:$0xff] }
  0x4a   :  { %v212_v47 = vunpack.c.h.bf16 %v88_v40 }
  0x4c   :  { %303 = vadd.xlane.f32.xlu1 %v302_v51  ;;  %300 = vadd.xlane.f32.xlu0 %v299_v52  ;;  %v350_v51 = vadd.f32 %v180_v44, %v179_v42  ;;  %v347_v52 = vadd.f32 %v178_v46, %v177_v45  ;;  %v209_v42 = vunpack.c.l.bf16 %v87_v39  ;;  %v210_v44 = vunpack.c.h.bf16 %v87_v39  ;;  %v89_v45 = vld [vmem:[#allocation3 + $0x1e0] sm:$0xff] }
  0x4d   :  { %v211_v46 = vunpack.c.l.bf16 %v88_v40 }
  0x50   :  { %309 = vadd.xlane.f32.xlu1 %v308_v57  ;;  %306 = vadd.xlane.f32.xlu0 %v305_v59  ;;  %v356_v57 = vadd.f32 %v184_v50, %v183_v49  ;;  %v353_v59 = vadd.f32 %v182_v54, %v181_v53  ;;  %v213_v49 = vunpack.c.l.bf16 %v89_v45  ;;  %v214_v50 = vunpack.c.h.bf16 %v89_v45  ;;  %v91_v53 = vld [vmem:[#allocation3 + $0x1f0] sm:$0xff] }
  0x51   :  { %v215_v54 = vunpack.c.l.bf16 %v90_v48 }
  0x54   :  { %315 = vadd.xlane.f32.xlu1 %v314_v3  ;;  %312 = vadd.xlane.f32.xlu0 %v311_v4  ;;  %v362_v3 = vadd.f32 %v188_v60, %v187_v58  ;;  %v359_v4 = vadd.f32 %v186_v62, %v185_v61  ;;  %v218_v58 = vunpack.c.h.bf16 %v91_v53  ;;  %v404_v60 = vadd.f32 %v216_v55, %v215_v54 }
  0x55   :  { %v219_v61 = vunpack.c.l.bf16 %v92_v56  ;;  %v220_v62 = vunpack.c.h.bf16 %v92_v56 }
  0x57   :  { %v410_v0 = vadd.f32 %v220_v62, %v219_v61 }
  0x58   :  { %321 = vadd.xlane.f32.xlu1 %v320_v9  ;;  %318 = vadd.xlane.f32.xlu0 %v317_v11  ;;  %v368_v9 = vadd.f32 %v192_v2, %v191_v1  ;;  %v365_v11 = vadd.f32 %v190_v6, %v189_v5  ;;  %v480_v1 = vlaneseq  ;;  %v3997_v2 = vmov 269488144  }
  0x59   :  { %v3999_v6 = vmov 1414812756  }
  0x5a   :  { %v492_v7 = vunpack.c.l.s4 %v3999_v6 }
  0x5c   :  { %327 = vadd.xlane.f32.xlu1 %v326_v19  ;;  %324 = vadd.xlane.f32.xlu0 %v323_v20  ;;  %v374_v19 = vadd.f32 %v196_v12, %v195_v10  ;;  %v371_v20 = vadd.f32 %v194_v14, %v193_v13  ;;  %v4027_v10 = vshrl.u32 %v480_v1, 7  ;;  %v493_v13 = vunpack.c.0.s8 %v492_v7 }
  0x60   :  { %333 = vadd.xlane.f32.xlu1 %v332_v25  ;;  %330 = vadd.xlane.f32.xlu0 %v329_v27  ;;  %v380_v25 = vadd.f32 %v200_v18, %v199_v17  ;;  %v377_v27 = vadd.f32 %v198_v22, %v197_v21  ;;  %v2273_v21 = vunpack.c.0.s8 %v2272_v16 }
  0x62   :  { %v4050_v32 = vsub.s32 %v2273_v21, %v4027_v10 }
  0x64   :  { %339 = vadd.xlane.f32.xlu1 %v338_v35  ;;  %336 = vadd.xlane.f32.xlu0 %v335_v36  ;;  %v383_v35 = vadd.f32 %v202_v28, %v201_v26  ;;  %v386_v36 = vadd.f32 %v204_v30, %v203_v29 }
  0x68   :  { %345 = vadd.xlane.f32.xlu1 %v344_v41  ;;  %342 = vadd.xlane.f32.xlu0 %v341_v43  ;;  %v389_v41 = vadd.f32 %v206_v34, %v205_v33  ;;  %v392_v43 = vadd.f32 %v208_v38, %v207_v37 }
  0x6c   :  { %351 = vadd.xlane.f32.xlu1 %v350_v51  ;;  %348 = vadd.xlane.f32.xlu0 %v347_v52  ;;  %v395_v51 = vadd.f32 %v210_v44, %v209_v42  ;;  %v398_v52 = vadd.f32 %v212_v47, %v211_v46 }
  0x70   :  { %357 = vadd.xlane.f32.xlu1 %v356_v57  ;;  %354 = vadd.xlane.f32.xlu0 %v353_v59  ;;  %v217_v57 = vunpack.c.l.bf16 %v91_v53  ;;  %v401_v59 = vadd.f32 %v214_v50, %v213_v49 }
  0x72   :  { %v407_v63 = vadd.f32 %v218_v58, %v217_v57 }
  0x74   :  { %363 = vadd.xlane.f32.xlu1 %v362_v3  ;;  %360 = vadd.xlane.f32.xlu0 %v359_v4  ;;  %v478_v3 = vunpack.c.l.s4 %v3997_v2  ;;  %v3998_v4 = vmov 842150450  }
  0x75   :  { %v485_v5 = vunpack.c.l.s4 %v3998_v4 }
  0x77   :  { %v486_v12 = vunpack.c.0.s8 %v485_v5 }
  0x78   :  { %369 = vadd.xlane.f32.xlu1 %v368_v9  ;;  %366 = vadd.xlane.f32.xlu0 %v365_v11  ;;  %v499_v9 = vunpack.c.l.s4 %v4000_v8  ;;  %v479_v11 = vunpack.c.0.s8 %v478_v3 }
  0x79   :  { %v4033_v18 = vsub.s32 %v486_v12, %v4027_v10 }
  0x7a   :  { %v500_v14 = vunpack.c.0.s8 %v499_v9  ;;  %v4030_v17 = vsub.s32 %v479_v11, %v4027_v10 }
  0x7c   :  { %375 = vadd.xlane.f32.xlu1 %v374_v19  ;;  %372 = vadd.xlane.f32.xlu0 %v371_v20  ;;  %v4036_v19 = vsub.s32 %v493_v13, %v4027_v10  ;;  %v4039_v20 = vsub.s32 %v500_v14, %v4027_v10 }
  0x80   :  { %381 = vadd.xlane.f32.xlu1 %v380_v25  ;;  %378 = vadd.xlane.f32.xlu0 %v377_v27 }
  0x84   :  { %384 = vadd.xlane.f32.xlu0 %v383_v35  ;;  %387 = vadd.xlane.f32.xlu1 %v386_v36 }
  0x88   :  { %390 = vadd.xlane.f32.xlu0 %v389_v41  ;;  %393 = vadd.xlane.f32.xlu1 %v392_v43 }
  0x8c   :  { %396 = vadd.xlane.f32.xlu0 %v395_v51  ;;  %399 = vadd.xlane.f32.xlu1 %v398_v52 }
  0x90   :  { %402 = vadd.xlane.f32.xlu0 %v401_v59  ;;  %405 = vadd.xlane.f32.xlu1 %v404_v60 }
  0x94   :  { %408 = vadd.xlane.f32.xlu0 %v407_v63  ;;  %411 = vadd.xlane.f32.xlu1 %v410_v0 }
  0xa5   :  { %v229_v22 = vpop.xlane.xlu1 %228  ;;  %v223_v23 = vpop.xlane.xlu0 %222 }
  0xa6   :  { %v539_v24 = vrot.slane %v229_v22, %v4030_v17  ;;  %v546_v25 = vrot.slane %v229_v22, %v4033_v18  ;;  %v553_v26 = vrot.slane %v229_v22, %v4036_v19  ;;  %v560_v27 = vrot.slane %v229_v22, %v4039_v20 }
  0xa7   :  { %v483_v28 = vrot.slane %v223_v23, %v4030_v17  ;;  %v490_v29 = vrot.slane %v223_v23, %v4033_v18  ;;  %v497_v30 = vrot.slane %v223_v23, %v4036_v19  ;;  %v504_v31 = vrot.slane %v223_v23, %v4039_v20 }
  0xa8   :  { %v2303_v37 = vcombine.low %v539_v24, %v546_v25  ;;  %v2304_v38 = vcombine.low %v553_v26, %v560_v27 }
  0xa9   :  { %v232_v33 = vpop.xlane.xlu1 %231  ;;  %v226_v34 = vpop.xlane.xlu0 %225  ;;  %v2269_v35 = vcombine.low %v483_v28, %v490_v29  ;;  %v2270_v36 = vcombine.low %v497_v30, %v504_v31 }
  0xaa   :  { %v511_v39 = vrot.slane %v226_v34, %v4030_v17  ;;  %v518_v40 = vrot.slane %v226_v34, %v4033_v18  ;;  %v525_v41 = vrot.slane %v226_v34, %v4036_v19  ;;  %v532_v42 = vrot.slane %v226_v34, %v4039_v20 }
  0xab   :  { %v567_v43 = vrot.slane %v232_v33, %v4030_v17  ;;  %v574_v44 = vrot.slane %v232_v33, %v4033_v18  ;;  %v2277_v45 = vrot.slane %v2269_v35, %v4050_v32  ;;  %v2284_v46 = vrot.slane %v2270_v36, %v4050_v32 }
  0xac   :  { %v581_v47 = vrot.slane %v232_v33, %v4036_v19  ;;  %v588_v48 = vrot.slane %v232_v33, %v4039_v20  ;;  %v2286_v51 = vcombine.low %v511_v39, %v518_v40  ;;  %v2287_v52 = vcombine.low %v525_v41, %v532_v42 }
  0xad   :  { %v238_v49 = vpop.xlane.xlu1 %237  ;;  %v235_v50 = vpop.xlane.xlu0 %234  ;;  %v2311_v53 = vrot.slane %v2303_v37, %v4050_v32  ;;  %v2285_v54 = vcombine.low %v2277_v45, %v2284_v46  ;;  %v2318_v57 = vrot.slane %v2304_v38, %v4050_v32  ;;  %v2320_v62 = vcombine.low %v567_v43, %v574_v44 }
  0xae   :  { %v2294_v55 = vrot.slane %v2286_v51, %v4050_v32  ;;  %v2301_v56 = vrot.slane %v2287_v52, %v4050_v32  ;;  %v595_v58 = vrot.slane %v235_v50, %v4030_v17  ;;  %v602_v59 = vrot.slane %v235_v50, %v4033_v18 }
  0xaf   :  { %v2321_v63 = vcombine.low %v581_v47, %v588_v48  ;;  %3358 = vperm.xlu0 %3943, %v2285_v54   ;;  %v623_v0 = vrot.slane %v238_v49, %v4030_v17  ;;  %v609_v2 = vrot.slane %v235_v50, %v4036_v19  ;;  %v616_v3 = vrot.slane %v235_v50, %v4039_v20 }
  0xb0   :  { %v630_v4 = vrot.slane %v238_v49, %v4033_v18  ;;  %v637_v5 = vrot.slane %v238_v49, %v4036_v19  ;;  %v644_v6 = vrot.slane %v238_v49, %v4039_v20  ;;  %v2302_v7 = vcombine.low %v2294_v55, %v2301_v56 }
  0xb1   :  { %v4068_v60 = vpop.xlane.xlu1 %243  ;;  %v241_v61 = vpop.xlane.xlu0 %240  ;;  %v2319_v11 = vcombine.low %v2311_v53, %v2318_v57  ;;  %v2328_v12 = vrot.slane %v2320_v62, %v4050_v32  ;;  %v2335_v13 = vrot.slane %v2321_v63, %v4050_v32  ;;  %v2337_v14 = vcombine.low %v595_v58, %v602_v59 }
  0xb2   :  { %3361 = vperm.xlu1 %3944, %v2302_v7   ;;  %v679_v23 = vrot.slane %v4068_v60, %v4030_v17  ;;  %v686_v24 = vrot.slane %v4068_v60, %v4033_v18  ;;  %v693_v25 = vrot.slane %v4068_v60, %v4036_v19  ;;  %v2338_v26 = vcombine.low %v609_v2, %v616_v3 }
  0xb3   :  { %v700_v27 = vrot.slane %v4068_v60, %v4039_v20  ;;  %v651_v28 = vrot.slane %v241_v61, %v4030_v17  ;;  %v658_v31 = vrot.slane %v241_v61, %v4033_v18  ;;  %v665_v33 = vrot.slane %v241_v61, %v4036_v19 }
  0xb4   :  { %v672_v34 = vrot.slane %v241_v61, %v4039_v20  ;;  %v2336_v37 = vcombine.low %v2328_v12, %v2335_v13  ;;  %v2345_v42 = vrot.slane %v2337_v14, %v4050_v32  ;;  %v2352_v43 = vrot.slane %v2338_v26, %v4050_v32 }
  0xb5   :  { %v250_v8 = vpop.xlane.xlu1 %249  ;;  %v4076_v9 = vpop.xlane.xlu0 %246  ;;  %v2354_v44 = vcombine.low %v623_v0, %v630_v4  ;;  %v2355_v45 = vcombine.low %v637_v5, %v644_v6  ;;  %v2371_v54 = vcombine.low %v651_v28, %v658_v31 }
  0xb6   :  { %v735_v15 = vrot.slane %v250_v8, %v4030_v17  ;;  %v742_v16 = vrot.slane %v250_v8, %v4033_v18  ;;  %v749_v21 = vrot.slane %v250_v8, %v4036_v19  ;;  %v756_v22 = vrot.slane %v250_v8, %v4039_v20  ;;  %3364 = vperm.xlu1 %3944, %v2319_v11  }
  0xb7   :  { %v707_v50 = vrot.slane %v4076_v9, %v4030_v17  ;;  %v714_v51 = vrot.slane %v4076_v9, %v4033_v18  ;;  %v2372_v55 = vcombine.low %v665_v33, %v672_v34  ;;  %v721_v60 = vrot.slane %v4076_v9, %v4036_v19 }
  0xb8   :  { %v2422_v29 = vcombine.low %v735_v15, %v742_v16  ;;  %v2423_v30 = vcombine.low %v749_v21, %v756_v22  ;;  %v2353_v61 = vcombine.low %v2345_v42, %v2352_v43  ;;  %v2362_v62 = vrot.slane %v2354_v44, %v4050_v32 }
  0xb9   :  { %v256_v35 = vpop.xlane.xlu1 %255  ;;  %v4096_v36 = vpop.xlane.xlu0 %252  ;;  %v2369_v63 = vrot.slane %v2355_v45, %v4050_v32  ;;  %v728_v5 = vrot.slane %v4076_v9, %v4039_v20  ;;  %v2379_v11 = vrot.slane %v2371_v54, %v4050_v32  ;;  %v2386_v12 = vrot.slane %v2372_v55, %v4050_v32 }
  0xba   :  { %v791_v38 = vrot.slane %v256_v35, %v4030_v17  ;;  %v798_v39 = vrot.slane %v256_v35, %v4033_v18  ;;  %v805_v40 = vrot.slane %v256_v35, %v4036_v19  ;;  %v812_v41 = vrot.slane %v256_v35, %v4039_v20  ;;  %3367 = vperm.xlu1 %3944, %v2336_v37  }
  0xbb   :  { %v2430_v46 = vrot.slane %v2422_v29, %v4050_v32  ;;  %v2437_v47 = vrot.slane %v2423_v30, %v4050_v32  ;;  %v763_v16 = vrot.slane %v4096_v36, %v4030_v17  ;;  %v2388_v21 = vcombine.low %v679_v23, %v686_v24 }
  0xbc   :  { %v2456_v48 = vcombine.low %v791_v38, %v798_v39  ;;  %v2457_v49 = vcombine.low %v805_v40, %v812_v41  ;;  %v2389_v22 = vcombine.low %v693_v25, %v700_v27  ;;  %v2370_v28 = vcombine.low %v2362_v62, %v2369_v63 }
  0xbd   :  { %v262_v52 = vpop.xlane.xlu1 %261  ;;  %v4110_v53 = vpop.xlane.xlu0 %258  ;;  %v2438_v0 = vcombine.low %v2430_v46, %v2437_v47  ;;  %v770_v31 = vrot.slane %v4096_v36, %v4033_v18  ;;  %v2387_v35 = vcombine.low %v2379_v11, %v2386_v12  ;;  %v2396_v39 = vrot.slane %v2388_v21, %v4050_v32 }
  0xbe   :  { %v847_v56 = vrot.slane %v262_v52, %v4030_v17  ;;  %v854_v57 = vrot.slane %v262_v52, %v4033_v18  ;;  %v861_v58 = vrot.slane %v262_v52, %v4036_v19  ;;  %v868_v59 = vrot.slane %v262_v52, %v4039_v20  ;;  %3370 = vperm.xlu1 %3944, %v2353_v61  }
  0xbf   :  { %v2464_v2 = vrot.slane %v2456_v48, %v4050_v32  ;;  %v2471_v3 = vrot.slane %v2457_v49, %v4050_v32  ;;  %3385 = vperm.xlu0 %3943, %v2438_v0   ;;  %v2403_v40 = vrot.slane %v2389_v22, %v4050_v32  ;;  %v2405_v41 = vcombine.low %v707_v50, %v714_v51 }
  0xc0   :  { %v2490_v4 = vcombine.low %v847_v56, %v854_v57  ;;  %v2491_v8 = vcombine.low %v861_v58, %v868_v59  ;;  %v2406_v45 = vcombine.low %v721_v60, %v728_v5  ;;  %v777_v46 = vrot.slane %v4096_v36, %v4036_v19 }
  0xc1   :  { %v268_v6 = vpop.xlane.xlu1 %267  ;;  %v4124_v7 = vpop.xlane.xlu0 %264  ;;  %v2472_v26 = vcombine.low %v2464_v2, %v2471_v3  ;;  %v784_v47 = vrot.slane %v4096_v36, %v4039_v20  ;;  %v819_v56 = vrot.slane %v4110_v53, %v4030_v17  ;;  %v2404_v58 = vcombine.low %v2396_v39, %v2403_v40 }
  0xc2   :  { %v903_v13 = vrot.slane %v268_v6, %v4030_v17  ;;  %v910_v14 = vrot.slane %v268_v6, %v4033_v18  ;;  %v917_v15 = vrot.slane %v268_v6, %v4036_v19  ;;  %v924_v9 = vrot.slane %v268_v6, %v4039_v20  ;;  %3373 = vperm.xlu1 %3944, %v2370_v28  }
  0xc3   :  { %v2498_v29 = vrot.slane %v2490_v4, %v4050_v32  ;;  %v2505_v30 = vrot.slane %v2491_v8, %v4050_v32  ;;  %3391 = vperm.xlu0 %3943, %v2472_v26   ;;  %v2413_v36 = vrot.slane %v2405_v41, %v4050_v32  ;;  %v2420_v62 = vrot.slane %v2406_v45, %v4050_v32 }
  0xc4   :  { %v2524_v37 = vcombine.low %v903_v13, %v910_v14  ;;  %v2525_v38 = vcombine.low %v917_v15, %v924_v9  ;;  %v2439_v4 = vcombine.low %v763_v16, %v770_v31  ;;  %v2440_v5 = vcombine.low %v777_v46, %v784_v47 }
  0xc5   :  { %v274_v33 = vpop.xlane.xlu1 %273  ;;  %v4138_v34 = vpop.xlane.xlu0 %270  ;;  %v2506_v42 = vcombine.low %v2498_v29, %v2505_v30  ;;  %v826_v12 = vrot.slane %v4110_v53, %v4033_v18  ;;  %v833_v13 = vrot.slane %v4110_v53, %v4036_v19  ;;  %v840_v14 = vrot.slane %v4110_v53, %v4039_v20 }
  0xc6   :  { %v959_v23 = vrot.slane %v274_v33, %v4030_v17  ;;  %v966_v24 = vrot.slane %v274_v33, %v4033_v18  ;;  %v973_v25 = vrot.slane %v274_v33, %v4036_v19  ;;  %v980_v27 = vrot.slane %v274_v33, %v4039_v20  ;;  %3376 = vperm.xlu1 %3944, %v2387_v35  }
  0xc7   :  { %v2532_v43 = vrot.slane %v2524_v37, %v4050_v32  ;;  %v2539_v44 = vrot.slane %v2525_v38, %v4050_v32  ;;  %3397 = vperm.xlu0 %3943, %v2506_v42   ;;  %v2421_v9 = vcombine.low %v2413_v36, %v2420_v62  ;;  %v2447_v29 = vrot.slane %v2439_v4, %v4050_v32 }
  0xc8   :  { %v2558_v52 = vcombine.low %v959_v23, %v966_v24  ;;  %v2559_v54 = vcombine.low %v973_v25, %v980_v27  ;;  %v2454_v30 = vrot.slane %v2440_v5, %v4050_v32  ;;  %v875_v37 = vrot.slane %v4124_v7, %v4030_v17 }
  0xc9   :  { %v280_v48 = vpop.xlane.xlu1 %279  ;;  %v4152_v49 = vpop.xlane.xlu0 %276  ;;  %v2540_v59 = vcombine.low %v2532_v43, %v2539_v44  ;;  %v882_v38 = vrot.slane %v4124_v7, %v4033_v18  ;;  %v2473_v43 = vcombine.low %v819_v56, %v826_v12  ;;  %v2474_v44 = vcombine.low %v833_v13, %v840_v14 }
  0xca   :  { %v1015_v50 = vrot.slane %v280_v48, %v4030_v17  ;;  %v1022_v51 = vrot.slane %v280_v48, %v4033_v18  ;;  %v1029_v55 = vrot.slane %v280_v48, %v4036_v19  ;;  %v1036_v57 = vrot.slane %v280_v48, %v4039_v20  ;;  %3379 = vperm.xlu1 %3944, %v2404_v58  }
  0xcb   :  { %v2566_v60 = vrot.slane %v2558_v52, %v4050_v32  ;;  %v2573_v61 = vrot.slane %v2559_v54, %v4050_v32  ;;  %3403 = vperm.xlu0 %3943, %v2540_v59   ;;  %v2455_v25 = vcombine.low %v2447_v29, %v2454_v30  ;;  %v889_v46 = vrot.slane %v4124_v7, %v4036_v19 }
  0xcc   :  { %v2592_v2 = vcombine.low %v1015_v50, %v1022_v51  ;;  %v2593_v3 = vcombine.low %v1029_v55, %v1036_v57  ;;  %v896_v47 = vrot.slane %v4124_v7, %v4039_v20  ;;  %v4200_v52 = vand.u32 127, %v480_v1 }
  0xcd   :  { %v286_v63 = vpop.xlane.xlu1 %285  ;;  %v4164_v0 = vpop.xlane.xlu0 %282  ;;  %v2574_v16 = vcombine.low %v2566_v60, %v2573_v61  ;;  %v2481_v51 = vrot.slane %v2473_v43, %v4050_v32  ;;  %v2488_v55 = vrot.slane %v2474_v44, %v4050_v32  ;;  %v2507_v59 = vcombine.low %v875_v37, %v882_v38 }
  0xce   :  { %v1071_v6 = vrot.slane %v286_v63, %v4030_v17  ;;  %v1078_v8 = vrot.slane %v286_v63, %v4033_v18  ;;  %v1085_v11 = vrot.slane %v286_v63, %v4036_v19  ;;  %v1092_v15 = vrot.slane %v286_v63, %v4039_v20  ;;  %3382 = vperm.xlu1 %3944, %v2421_v9  }
  0xcf   :  { %v2600_v21 = vrot.slane %v2592_v2, %v4050_v32  ;;  %v2607_v22 = vrot.slane %v2593_v3, %v4050_v32  ;;  %3409 = vperm.xlu0 %3943, %v2574_v16   ;;  %v2489_v60 = vcombine.low %v2481_v51, %v2488_v55  ;;  %v4211_v61 = vadd.s32 4294967288, %v4200_v52 }
  0xd0   :  { %v2626_v31 = vcombine.low %v1071_v6, %v1078_v8  ;;  %v2627_v33 = vcombine.low %v1085_v11, %v1092_v15  ;;  %v931_v62 = vrot.slane %v4138_v34, %v4030_v17  ;;  %v938_v63 = vrot.slane %v4138_v34, %v4033_v18 }
  0xd1   :  { %v292_v26 = vpop.xlane.xlu1 %291  ;;  %v4178_v28 = vpop.xlane.xlu0 %288  ;;  %v2608_v24 = vcombine.low %v2600_v21, %v2607_v22  ;;  %v945_v2 = vrot.slane %v4138_v34, %v4036_v19  ;;  %v952_v3 = vrot.slane %v4138_v34, %v4039_v20  ;;  %v987_v4 = vrot.slane %v4152_v49, %v4030_v17 }
  0xd2   :  { %v1127_v53 = vrot.slane %v292_v26, %v4030_v17  ;;  %v1134_v35 = vrot.slane %v292_v26, %v4033_v18  ;;  %v1141_v23 = vrot.slane %v292_v26, %v4036_v19  ;;  %v2634_v27 = vrot.slane %v2626_v31, %v4050_v32  ;;  %3388 = vperm.xlu1 %3944, %v2455_v25  }
  0xd3   :  { %v1148_v39 = vrot.slane %v292_v26, %v4039_v20  ;;  %v2641_v42 = vrot.slane %v2627_v33, %v4050_v32  ;;  %3415 = vperm.xlu0 %3943, %v2608_v24   ;;  %v994_v5 = vrot.slane %v4152_v49, %v4033_v18  ;;  %v2508_v8 = vcombine.low %v889_v46, %v896_v47 }
  0xd4   :  { %v2660_v45 = vcombine.low %v1127_v53, %v1134_v35  ;;  %v1001_v11 = vrot.slane %v4152_v49, %v4036_v19  ;;  %v2515_v12 = vrot.slane %v2507_v59, %v4050_v32  ;;  %v1008_v16 = vrot.slane %v4152_v49, %v4039_v20 }
  0xd5   :  { %v298_v40 = vpop.xlane.xlu1 %297  ;;  %v4191_v41 = vpop.xlane.xlu0 %294  ;;  %v2642_v50 = vcombine.low %v2634_v27, %v2641_v42  ;;  %v2661_v7 = vcombine.low %v1141_v23, %v1148_v39  ;;  %v2522_v21 = vrot.slane %v2508_v8, %v4050_v32  ;;  %v4237_v22 = vadd.s32 4294967280, %v4200_v52 }
  0xd6   :  { %v1183_v48 = vrot.slane %v298_v40, %v4030_v17  ;;  %v1190_v54 = vrot.slane %v298_v40, %v4033_v18  ;;  %v1197_v56 = vrot.slane %v298_v40, %v4036_v19  ;;  %v1204_v57 = vrot.slane %v298_v40, %v4039_v20  ;;  %3394 = vperm.xlu1 %3944, %v2489_v60  }
  0xd7   :  { %3421 = vperm.xlu0 %3943, %v2642_v50   ;;  %v2668_v1 = vrot.slane %v2660_v45, %v4050_v32  ;;  %v2675_v6 = vrot.slane %v2661_v7, %v4050_v32  ;;  %v1043_v26 = vrot.slane %v4164_v0, %v4030_v17  ;;  %v1050_v29 = vrot.slane %v4164_v0, %v4033_v18 }
  0xd8   :  { %v2694_v34 = vcombine.low %v1183_v48, %v1190_v54  ;;  %v2695_v15 = vcombine.low %v1197_v56, %v1204_v57  ;;  %v1057_v30 = vrot.slane %v4164_v0, %v4036_v19  ;;  %v2523_v35 = vcombine.low %v2515_v12, %v2522_v21 }
  0xd9   :  { %v304_v58 = vpop.xlane.xlu1 %303  ;;  %v4207_v36 = vpop.xlane.xlu0 %300  ;;  %v2676_v9 = vcombine.low %v2668_v1, %v2675_v6  ;;  %v2541_v23 = vcombine.low %v931_v62, %v938_v63  ;;  %v2542_v24 = vcombine.low %v945_v2, %v952_v3  ;;  %v1064_v39 = vrot.slane %v4164_v0, %v4039_v20 }
  0xda   :  { %v1239_v31 = vrot.slane %v304_v58, %v4030_v17  ;;  %v1246_v33 = vrot.slane %v304_v58, %v4033_v18  ;;  %v1253_v49 = vrot.slane %v304_v58, %v4036_v19  ;;  %v1260_v53 = vrot.slane %v304_v58, %v4039_v20  ;;  %3400 = vperm.xlu1 %3944, %v2523_v35  }
  0xdb   :  { %3427 = vperm.xlu0 %3943, %v2676_v9   ;;  %v2702_v37 = vrot.slane %v2694_v34, %v4050_v32  ;;  %v2709_v38 = vrot.slane %v2695_v15, %v4050_v32  ;;  %v1099_v40 = vrot.slane %v4178_v28, %v4030_v17  ;;  %v1106_v42 = vrot.slane %v4178_v28, %v4033_v18 }
  0xdc   :  { %v1155_v43 = vrot.slane %v4191_v41, %v4030_v17  ;;  %v1162_v44 = vrot.slane %v4191_v41, %v4033_v18  ;;  %v2549_v46 = vrot.slane %v2541_v23, %v4050_v32  ;;  %v2556_v47 = vrot.slane %v2542_v24, %v4050_v32 }
  0xdd   :  { %v4229_v13 = vpop.xlane.xlu1 %309  ;;  %v4231_v14 = vpop.xlane.xlu0 %306  ;;  %v2710_v45 = vcombine.low %v2702_v37, %v2709_v38  ;;  %v1113_v0 = vrot.slane %v4178_v28, %v4036_v19  ;;  %v1169_v48 = vrot.slane %v4191_v41, %v4036_v19  ;;  %v1176_v54 = vrot.slane %v4191_v41, %v4039_v20 }
  0xde   :  { %v1295_v50 = vrot.slane %v4229_v13, %v4030_v17  ;;  %v1302_v51 = vrot.slane %v4229_v13, %v4033_v18  ;;  %v2557_v55 = vcombine.low %v2549_v46, %v2556_v47  ;;  %v2728_v56 = vcombine.low %v1239_v31, %v1246_v33 }
  0xdf   :  { %3433 = vperm.xlu0 %3943, %v2710_v45   ;;  %v2729_v57 = vcombine.low %v1253_v49, %v1260_v53  ;;  %v1309_v59 = vrot.slane %v4229_v13, %v4036_v19  ;;  %v1316_v41 = vrot.slane %v4229_v13, %v4039_v20  ;;  %v2575_v60 = vcombine.low %v987_v4, %v994_v5 }
  0xe0   :  { %v2576_v1 = vcombine.low %v1001_v11, %v1008_v16  ;;  %v1120_v62 = vrot.slane %v4178_v28, %v4039_v20  ;;  %v4287_v63 = vcombine.low %v1155_v43, %v1162_v44  ;;  %3406 = vperm.xlu1 %3944, %v2557_v55   ;;  %v2736_v2 = vrot.slane %v2728_v56, %v4050_v32 }
  0xe1   :  { %v4251_v25 = vpop.xlane.xlu1 %315  ;;  %v4253_v27 = vpop.xlane.xlu0 %312  ;;  %v2743_v3 = vrot.slane %v2729_v57, %v4050_v32  ;;  %v1211_v6 = vrot.slane %v4207_v36, %v4030_v17  ;;  %v1218_v8 = vrot.slane %v4207_v36, %v4033_v18  ;;  %v2583_v12 = vrot.slane %v2575_v60, %v4050_v32 }
  0xe2   :  { %v2590_v4 = vrot.slane %v2576_v1, %v4050_v32  ;;  %v4297_v5 = vcombine.low %v1169_v48, %v1176_v54  ;;  %v1225_v11 = vrot.slane %v4207_v36, %v4036_v19  ;;  %v1351_v13 = vrot.slane %v4251_v25, %v4030_v17 }
  0xe3   :  { %v2744_v34 = vcombine.low %v2736_v2, %v2743_v3  ;;  %v1358_v9 = vrot.slane %v4251_v25, %v4033_v18  ;;  %v2762_v31 = vcombine.low %v1295_v50, %v1302_v51  ;;  %v2763_v33 = vcombine.low %v1309_v59, %v1316_v41 }
  0xe4   :  { %v2591_v21 = vcombine.low %v2583_v12, %v2590_v4  ;;  %v1365_v49 = vrot.slane %v4251_v25, %v4036_v19  ;;  %v1372_v53 = vrot.slane %v4251_v25, %v4039_v20  ;;  %v2609_v35 = vcombine.low %v1043_v26, %v1050_v29 }
  0xe5   :  { %v4277_v58 = vpop.xlane.xlu1 %321  ;;  %v4279_v7 = vpop.xlane.xlu0 %318  ;;  %3439 = vperm.xlu0 %3943, %v2744_v34   ;;  %v2610_v37 = vcombine.low %v1057_v30, %v1064_v39  ;;  %v1232_v38 = vrot.slane %v4207_v36, %v4039_v20  ;;  %v4315_v23 = vcombine.low %v1211_v6, %v1218_v8  ;;  %v2770_v24 = vrot.slane %v2762_v31, %v4050_v32 }
  0xe6   :  { %3412 = vperm.xlu1 %3944, %v2591_v21   ;;  %v2777_v43 = vrot.slane %v2763_v33, %v4050_v32  ;;  %v1267_v44 = vrot.slane %v4231_v14, %v4030_v17  ;;  %v1274_v45 = vrot.slane %v4231_v14, %v4033_v18  ;;  %v2617_v25 = vrot.slane %v2609_v35, %v4050_v32 }
  0xe7   :  { %v2624_v26 = vrot.slane %v2610_v37, %v4050_v32  ;;  %v1281_v30 = vrot.slane %v4231_v14, %v4036_v19  ;;  %v1288_v39 = vrot.slane %v4231_v14, %v4039_v20  ;;  %v1323_v46 = vrot.slane %v4253_v27, %v4030_v17 }
  0xe8   :  { %v2778_v47 = vcombine.low %v2770_v24, %v2777_v43  ;;  %v1330_v48 = vrot.slane %v4253_v27, %v4033_v18  ;;  %v2796_v50 = vcombine.low %v1351_v13, %v1358_v9  ;;  %v2797_v51 = vcombine.low %v1365_v49, %v1372_v53 }
  0xe9   :  { %v4303_v15 = vpop.xlane.xlu1 %327  ;;  %v4305_v16 = vpop.xlane.xlu0 %324  ;;  %v2625_v54 = vcombine.low %v2617_v25, %v2624_v26  ;;  %v1407_v55 = vrot.slane %v4277_v58, %v4030_v17  ;;  %v1414_v56 = vrot.slane %v4277_v58, %v4033_v18  ;;  %v2643_v14 = vcombine.low %v1099_v40, %v1106_v42 }
  0xea   :  { %3445 = vperm.xlu0 %3943, %v2778_v47   ;;  %v2644_v57 = vcombine.low %v1113_v0, %v1120_v62  ;;  %v1421_v59 = vrot.slane %v4277_v58, %v4036_v19  ;;  %v1428_v41 = vrot.slane %v4277_v58, %v4039_v20  ;;  %v2804_v60 = vrot.slane %v2796_v50, %v4050_v32 }
  0xeb   :  { %3418 = vperm.xlu1 %3944, %v2625_v54   ;;  %v2811_v1 = vrot.slane %v2797_v51, %v4050_v32  ;;  %v2712_v6 = vcombine.low %v1225_v11, %v1232_v38  ;;  %v4357_v8 = vcombine.low %v1267_v44, %v1274_v45  ;;  %v2651_v28 = vrot.slane %v2643_v14, %v4050_v32 }
  0xec   :  { %v2658_v40 = vrot.slane %v2644_v57, %v4050_v32  ;;  %v4361_v42 = vcombine.low %v1281_v30, %v1288_v39  ;;  %v1337_v0 = vrot.slane %v4253_v27, %v4036_v19  ;;  %v1344_v58 = vrot.slane %v4253_v27, %v4039_v20 }
  0xed   :  { %v4325_v29 = vpop.xlane.xlu1 %333  ;;  %v4327_v36 = vpop.xlane.xlu0 %330  ;;  %v2812_v62 = vcombine.low %v2804_v60, %v2811_v1  ;;  %v4367_v12 = vcombine.low %v1323_v46, %v1330_v48  ;;  %v1463_v4 = vrot.slane %v4303_v15, %v4030_v17  ;;  %v1470_v11 = vrot.slane %v4303_v15, %v4033_v18 }
  0xee   :  { %v2659_v13 = vcombine.low %v2651_v28, %v2658_v40  ;;  %v1477_v34 = vrot.slane %v4303_v15, %v4036_v19  ;;  %v2830_v9 = vcombine.low %v1407_v55, %v1414_v56  ;;  %v2831_v21 = vcombine.low %v1421_v59, %v1428_v41 }
  0xef   :  { %3451 = vperm.xlu0 %3943, %v2812_v62   ;;  %v2685_v31 = vrot.slane %v4287_v63, %v4050_v32  ;;  %v1484_v49 = vrot.slane %v4303_v15, %v4039_v20  ;;  %v1519_v53 = vrot.slane %v4325_v29, %v4030_v17  ;;  %v1526_v35 = vrot.slane %v4325_v29, %v4033_v18 }
  0xf0   :  { %3424 = vperm.xlu1 %3944, %v2659_v13   ;;  %v2692_v37 = vrot.slane %v4297_v5, %v4050_v32  ;;  %v1533_v63 = vrot.slane %v4325_v29, %v4036_v19  ;;  %v1540_v38 = vrot.slane %v4325_v29, %v4039_v20  ;;  %v2838_v24 = vrot.slane %v2830_v9, %v4050_v32 }
  0xf1   :  { %v4353_v2 = vpop.xlane.xlu1 %339  ;;  %v4355_v3 = vpop.xlane.xlu0 %336  ;;  %v2845_v15 = vrot.slane %v2831_v21, %v4050_v32  ;;  %v1379_v43 = vrot.slane %v4279_v7, %v4030_v17  ;;  %v1386_v44 = vrot.slane %v4279_v7, %v4033_v18  ;;  %v1393_v45 = vrot.slane %v4279_v7, %v4036_v19 }
  0xf2   :  { %v2693_v5 = vcombine.low %v2685_v31, %v2692_v37  ;;  %v1400_v25 = vrot.slane %v4279_v7, %v4039_v20  ;;  %v1435_v26 = vrot.slane %v4305_v16, %v4030_v17  ;;  %v1442_v29 = vrot.slane %v4305_v16, %v4033_v18 }
  0xf3   :  { %v2846_v30 = vcombine.low %v2838_v24, %v2845_v15  ;;  %v1449_v47 = vrot.slane %v4305_v16, %v4036_v19  ;;  %v2864_v48 = vcombine.low %v1463_v4, %v1470_v11  ;;  %v2865_v54 = vcombine.low %v1477_v34, %v1484_v49 }
  0xf4   :  { %3430 = vperm.xlu1 %3944, %v2693_v5   ;;  %v2719_v7 = vrot.slane %v4315_v23, %v4050_v32  ;;  %v1456_v50 = vrot.slane %v4305_v16, %v4039_v20  ;;  %v2898_v51 = vcombine.low %v1519_v53, %v1526_v35  ;;  %v2899_v55 = vcombine.low %v1533_v63, %v1540_v38 }
  0xf5   :  { %v4377_v27 = vpop.xlane.xlu1 %345  ;;  %v4379_v33 = vpop.xlane.xlu0 %342  ;;  %3457 = vperm.xlu0 %3943, %v2846_v30   ;;  %v2726_v56 = vrot.slane %v2712_v6, %v4050_v32  ;;  %v1491_v14 = vrot.slane %v4327_v36, %v4030_v17  ;;  %v1498_v57 = vrot.slane %v4327_v36, %v4033_v18  ;;  %v2872_v59 = vrot.slane %v2864_v48, %v4050_v32 }
  0xf6   :  { %v2879_v41 = vrot.slane %v2865_v54, %v4050_v32  ;;  %v2780_v60 = vcombine.low %v1337_v0, %v1344_v58  ;;  %v1505_v23 = vrot.slane %v4327_v36, %v4036_v19  ;;  %v1512_v16 = vrot.slane %v4327_v36, %v4039_v20 }
  0xf7   :  { %v2727_v1 = vcombine.low %v2719_v7, %v2726_v56  ;;  %v2813_v40 = vcombine.low %v1379_v43, %v1386_v44  ;;  %v1575_v62 = vrot.slane %v4353_v2, %v4030_v17  ;;  %v1582_v4 = vrot.slane %v4353_v2, %v4033_v18 }
  0xf8   :  { %v2880_v11 = vcombine.low %v2872_v59, %v2879_v41  ;;  %v2814_v0 = vcombine.low %v1393_v45, %v1400_v25  ;;  %v2906_v58 = vrot.slane %v2898_v51, %v4050_v32  ;;  %v2913_v13 = vrot.slane %v2899_v55, %v4050_v32 }
  0xf9   :  { %v4407_v39 = vpop.xlane.xlu1 %351  ;;  %v4409_v46 = vpop.xlane.xlu0 %348  ;;  %3436 = vperm.xlu1 %3944, %v2727_v1   ;;  %v2753_v36 = vrot.slane %v4357_v8, %v4050_v32  ;;  %v4440_v34 = vcombine.low %v1435_v26, %v1442_v29  ;;  %v4442_v9 = vcombine.low %v1449_v47, %v1456_v50  ;;  %v4444_v21 = vcombine.low %v1491_v14, %v1498_v57 }
  0xfa   :  { %3463 = vperm.xlu0 %3943, %v2880_v11   ;;  %v2760_v31 = vrot.slane %v4361_v42, %v4050_v32  ;;  %v4448_v49 = vcombine.low %v1505_v23, %v1512_v16  ;;  %v1589_v53 = vrot.slane %v4353_v2, %v4036_v19  ;;  %v1596_v35 = vrot.slane %v4353_v2, %v4039_v20 }
  0xfb   :  { %v2914_v37 = vcombine.low %v2906_v58, %v2913_v13  ;;  %v4458_v38 = vcombine.low %v1575_v62, %v1582_v4  ;;  %v1547_v24 = vrot.slane %v4355_v3, %v4030_v17  ;;  %v1554_v42 = vrot.slane %v4355_v3, %v4033_v18 }
  0xfc   :  { %v2761_v15 = vcombine.low %v2753_v36, %v2760_v31  ;;  %v1561_v43 = vrot.slane %v4355_v3, %v4036_v19  ;;  %v1568_v2 = vrot.slane %v4355_v3, %v4039_v20  ;;  %v2787_v44 = vrot.slane %v4367_v12, %v4050_v32 }
  0xfd   :  { %v4428_v28 = vpop.xlane.xlu1 %357  ;;  %v4430_v6 = vpop.xlane.xlu0 %354  ;;  %v2794_v45 = vrot.slane %v2780_v60, %v4050_v32  ;;  %v1631_v5 = vrot.slane %v4377_v27, %v4030_v17  ;;  %v1638_v25 = vrot.slane %v4377_v27, %v4033_v18  ;;  %v1645_v26 = vrot.slane %v4377_v27, %v4036_v19 }
  0xfe   :  { %3469 = vperm.xlu0 %3943, %v2914_v37   ;;  %3442 = vperm.xlu1 %3944, %v2761_v15   ;;  %v4478_v29 = vadd.s32 4294967272, %v4200_v52  ;;  %v1652_v3 = vrot.slane %v4377_v27, %v4039_v20  ;;  %v1603_v12 = vrot.slane %v4379_v33, %v4030_v17  ;;  %v1610_v30 = vrot.slane %v4379_v33, %v4033_v18 }
  0xff   :  { %v1617_v47 = vrot.slane %v4379_v33, %v4036_v19  ;;  %v1624_v7 = vrot.slane %v4379_v33, %v4039_v20  ;;  %v1687_v50 = vrot.slane %v4407_v39, %v4030_v17  ;;  %v1694_v27 = vrot.slane %v4407_v39, %v4033_v18 }
 0x100   :  { %v2795_v51 = vcombine.low %v2787_v44, %v2794_v45  ;;  %v1701_v55 = vrot.slane %v4407_v39, %v4036_v19  ;;  %v1708_v56 = vrot.slane %v4407_v39, %v4039_v20  ;;  %v2821_v14 = vrot.slane %v2813_v40, %v4050_v32 }
 0x101   :  { %v4454_v8 = vpop.xlane.xlu1 %363  ;;  %v4456_v63 = vpop.xlane.xlu0 %360  ;;  %v2828_v57 = vrot.slane %v2814_v0, %v4050_v32  ;;  %v4500_v59 = vcombine.low %v1589_v53, %v1596_v35  ;;  %v2915_v33 = vcombine.low %v1547_v24, %v1554_v42  ;;  %v1659_v41 = vrot.slane %v4409_v46, %v4030_v17 }
 0x102   :  { %v1666_v60 = vrot.slane %v4409_v46, %v4033_v18  ;;  %3448 = vperm.xlu1 %3944, %v2795_v51   ;;  %v2916_v23 = vcombine.low %v1561_v43, %v1568_v2  ;;  %v4506_v16 = vcombine.low %v1631_v5, %v1638_v25  ;;  %v4508_v1 = vcombine.low %v1645_v26, %v1652_v3 }
 0x103   :  { %v4510_v39 = vcombine.low %v1603_v12, %v1610_v30  ;;  %v4512_v62 = vcombine.low %v1617_v47, %v1624_v7  ;;  %v4514_v4 = vcombine.low %v1687_v50, %v1694_v27  ;;  %v1673_v11 = vrot.slane %v4409_v46, %v4036_v19 }
 0x104   :  { %v2829_v0 = vcombine.low %v2821_v14, %v2828_v57  ;;  %v4518_v13 = vcombine.low %v1701_v55, %v1708_v56  ;;  %v2855_v36 = vrot.slane %v4440_v34, %v4050_v32  ;;  %v2862_v31 = vrot.slane %v4442_v9, %v4050_v32 }
 0x105   :  { %v370_v48 = vpop.xlane.xlu1 %369  ;;  %v367_v54 = vpop.xlane.xlu0 %366  ;;  %v1680_v35 = vrot.slane %v4409_v46, %v4039_v20  ;;  %v4527_v37 = vcombine.low %v1659_v41, %v1666_v60  ;;  %v2889_v5 = vrot.slane %v4444_v21, %v4050_v32  ;;  %v2896_v12 = vrot.slane %v4448_v49, %v4050_v32 }
 0x106   :  { %v1855_v53 = vrot.slane %v370_v48, %v4030_v17  ;;  %3454 = vperm.xlu1 %3944, %v2829_v0   ;;  %v1862_v24 = vrot.slane %v370_v48, %v4033_v18  ;;  %v1869_v42 = vrot.slane %v370_v48, %v4036_v19  ;;  %v2863_v15 = vcombine.low %v2855_v36, %v2862_v31 }
 0x107   :  { %v1876_v43 = vrot.slane %v370_v48, %v4039_v20  ;;  %v1827_v34 = vrot.slane %v367_v54, %v4030_v17  ;;  %v1834_v2 = vrot.slane %v367_v54, %v4033_v18  ;;  %v1841_v44 = vrot.slane %v367_v54, %v4036_v19 }
 0x108   :  { %v3102_v9 = vcombine.low %v1855_v53, %v1862_v24  ;;  %v1848_v45 = vrot.slane %v367_v54, %v4039_v20  ;;  %v2897_v27 = vcombine.low %v2889_v5, %v2896_v12  ;;  %v2923_v57 = vrot.slane %v2915_v33, %v4050_v32 }
 0x109   :  { %v373_v40 = vpop.xlane.xlu0 %372  ;;  %v376_v58 = vpop.xlane.xlu1 %375  ;;  %v3103_v26 = vcombine.low %v1869_v42, %v1876_v43  ;;  %v3085_v3 = vcombine.low %v1827_v34, %v1834_v2  ;;  %v2930_v60 = vrot.slane %v2916_v23, %v4050_v32 }
 0x10a   :  { %v1911_v30 = vrot.slane %v376_v58, %v4030_v17  ;;  %3460 = vperm.xlu1 %3944, %v2863_v15   ;;  %v3086_v47 = vcombine.low %v1841_v44, %v1848_v45  ;;  %v1918_v48 = vrot.slane %v376_v58, %v4033_v18  ;;  %v1925_v7 = vrot.slane %v376_v58, %v4036_v19 }
 0x10b   :  { %v1932_v50 = vrot.slane %v376_v58, %v4039_v20  ;;  %v1883_v21 = vrot.slane %v373_v40, %v4030_v17  ;;  %v1890_v51 = vrot.slane %v373_v40, %v4033_v18  ;;  %v1897_v55 = vrot.slane %v373_v40, %v4036_v19 }
 0x10c   :  { %v3136_v56 = vcombine.low %v1911_v30, %v1918_v48  ;;  %v1904_v14 = vrot.slane %v373_v40, %v4039_v20  ;;  %v2931_v15 = vcombine.low %v2923_v57, %v2930_v60  ;;  %v3110_v2 = vrot.slane %v3102_v9, %v4050_v32 }
 0x10d   :  { %v379_v25 = vpop.xlane.xlu0 %378  ;;  %v382_v54 = vpop.xlane.xlu1 %381  ;;  %v3137_v49 = vcombine.low %v1925_v7, %v1932_v50  ;;  %v3119_v41 = vcombine.low %v1883_v21, %v1890_v51  ;;  %v3117_v44 = vrot.slane %v3103_v26, %v4050_v32  ;;  %v3093_v5 = vrot.slane %v3085_v3, %v4050_v32 }
 0x10e   :  { %v1967_v0 = vrot.slane %v382_v54, %v4030_v17  ;;  %v1974_v58 = vrot.slane %v382_v54, %v4033_v18  ;;  %3466 = vperm.xlu1 %3944, %v2897_v27   ;;  %v3120_v36 = vcombine.low %v1897_v55, %v1904_v14  ;;  %v1981_v31 = vrot.slane %v382_v54, %v4036_v19 }
 0x10f   :  { %v1988_v53 = vrot.slane %v382_v54, %v4039_v20  ;;  %v1939_v24 = vrot.slane %v379_v25, %v4030_v17  ;;  %v1946_v33 = vrot.slane %v379_v25, %v4033_v18  ;;  %v1953_v43 = vrot.slane %v379_v25, %v4036_v19 }
 0x110   :  { %v3170_v40 = vcombine.low %v1967_v0, %v1974_v58  ;;  %v1960_v34 = vrot.slane %v379_v25, %v4039_v20  ;;  %v3100_v12 = vrot.slane %v3086_v47, %v4050_v32  ;;  %v3118_v50 = vcombine.low %v3110_v2, %v3117_v44 }
 0x111   :  { %v385_v42 = vpop.xlane.xlu0 %384  ;;  %v3171_v23 = vcombine.low %v1981_v31, %v1988_v53  ;;  %v3153_v45 = vcombine.low %v1939_v24, %v1946_v33  ;;  %v388_v48 = vpop.xlane.xlu1 %387  ;;  %v3144_v26 = vrot.slane %v3136_v56, %v4050_v32  ;;  %v3151_v21 = vrot.slane %v3137_v49, %v4050_v32 }
 0x112   :  { %v1995_v30 = vrot.slane %v385_v42, %v4030_v17  ;;  %3472 = vperm.xlu1 %3944, %v2931_v15   ;;  %v3154_v7 = vcombine.low %v1953_v43, %v1960_v34  ;;  %v2002_v54 = vrot.slane %v385_v42, %v4033_v18  ;;  %v2009_v27 = vrot.slane %v385_v42, %v4036_v19 }
 0x113   :  { %v3101_v25 = vcombine.low %v3093_v5, %v3100_v12  ;;  %v2016_v9 = vrot.slane %v385_v42, %v4039_v20  ;;  %v3127_v47 = vrot.slane %v3119_v41, %v4050_v32  ;;  %v3134_v51 = vrot.slane %v3120_v36, %v4050_v32 }
 0x114   :  { %v3187_v3 = vcombine.low %v1995_v30, %v2002_v54  ;;  %v2023_v55 = vrot.slane %v388_v48, %v4030_v17  ;;  %v3152_v60 = vcombine.low %v3144_v26, %v3151_v21  ;;  %v2030_v0 = vrot.slane %v388_v48, %v4033_v18 }
 0x115   :  { %v391_v14 = vpop.xlane.xlu0 %390  ;;  %3502 = vperm.xlu0 %3943, %v3101_v25   ;;  %v3188_v57 = vcombine.low %v2009_v27, %v2016_v9  ;;  %v2037_v58 = vrot.slane %v388_v48, %v4036_v19  ;;  %v3135_v31 = vcombine.low %v3127_v47, %v3134_v51  ;;  %v2044_v56 = vrot.slane %v388_v48, %v4039_v20 }
 0x116   :  { %3505 = vperm.xlu1 %3944, %v3118_v50   ;;  %v3178_v49 = vrot.slane %v3170_v40, %v4050_v32  ;;  %v3185_v41 = vrot.slane %v3171_v23, %v4050_v32  ;;  %v1743_v36 = vrot.slane %v4428_v28, %v4030_v17  ;;  %v3161_v53 = vrot.slane %v3153_v45, %v4050_v32  ;;  %v394_v45 = vpop.xlane.xlu1 %393 }
 0x117   :  { %v3168_v24 = vrot.slane %v3154_v7, %v4050_v32  ;;  %v2051_v42 = vrot.slane %v391_v14, %v4030_v17  ;;  %v4587_v15 = vcombine.low %v1673_v11, %v1680_v35  ;;  %v1750_v40 = vrot.slane %v4428_v28, %v4033_v18 }
 0x118   :  { %v2058_v33 = vrot.slane %v391_v14, %v4033_v18  ;;  %v2065_v43 = vrot.slane %v391_v14, %v4036_v19  ;;  %v3204_v23 = vcombine.low %v2023_v55, %v2030_v0  ;;  %v3205_v34 = vcombine.low %v2037_v58, %v2044_v56 }
 0x119   :  { %3508 = vperm.xlu0 %3943, %v3135_v31   ;;  %v3169_v2 = vcombine.low %v3161_v53, %v3168_v24  ;;  %v2072_v44 = vrot.slane %v391_v14, %v4039_v20  ;;  %v1757_v5 = vrot.slane %v4428_v28, %v4036_v19  ;;  %v3186_v46 = vcombine.low %v3178_v49, %v3185_v41  ;;  %v397_v50 = vpop.xlane.xlu0 %396 }
 0x11a   :  { %3511 = vperm.xlu1 %3944, %v3152_v60   ;;  %v3195_v11 = vrot.slane %v3187_v3, %v4050_v32  ;;  %v3202_v35 = vrot.slane %v3188_v57, %v4050_v32  ;;  %v1764_v12 = vrot.slane %v4428_v28, %v4039_v20  ;;  %v3221_v30 = vcombine.low %v2051_v42, %v2058_v33 }
 0x11b   :  { %v2940_v48 = vrot.slane %v4458_v38, %v4050_v32  ;;  %v2947_v7 = vrot.slane %v4500_v59, %v4050_v32  ;;  %v3222_v54 = vcombine.low %v2065_v43, %v2072_v44  ;;  %v2079_v27 = vrot.slane %v394_v45, %v4030_v17  ;;  %v400_v38 = vpop.xlane.xlu1 %399 }
 0x11c   :  { %v2086_v25 = vrot.slane %v394_v45, %v4033_v18  ;;  %v2093_v9 = vrot.slane %v394_v45, %v4036_v19  ;;  %v3203_v26 = vcombine.low %v3195_v11, %v3202_v35  ;;  %v2100_v21 = vrot.slane %v394_v45, %v4039_v20 }
 0x11d   :  { %3514 = vperm.xlu0 %3943, %v3169_v2   ;;  %v3212_v28 = vrot.slane %v3204_v23, %v4050_v32  ;;  %v3219_v3 = vrot.slane %v3205_v34, %v4050_v32  ;;  %v4610_v47 = vcombine.low %v1743_v36, %v1750_v40  ;;  %v1715_v59 = vrot.slane %v4430_v6, %v4030_v17  ;;  %v403_v24 = vpop.xlane.xlu0 %402 }
 0x11e   :  { %v1722_v51 = vrot.slane %v4430_v6, %v4033_v18  ;;  %v1729_v55 = vrot.slane %v4430_v6, %v4036_v19  ;;  %3517 = vperm.xlu1 %3944, %v3186_v46   ;;  %v2957_v14 = vrot.slane %v4510_v39, %v4050_v32  ;;  %v2964_v57 = vrot.slane %v4512_v62, %v4050_v32 }
 0x11f   :  { %v2107_v60 = vrot.slane %v397_v50, %v4030_v17  ;;  %v2114_v0 = vrot.slane %v397_v50, %v4033_v18  ;;  %v2948_v58 = vcombine.low %v2940_v48, %v2947_v7  ;;  %v3238_v31 = vcombine.low %v2079_v27, %v2086_v25  ;;  %v406_v44 = vpop.xlane.xlu1 %405 }
 0x120   :  { %v2121_v56 = vrot.slane %v397_v50, %v4036_v19  ;;  %v2128_v49 = vrot.slane %v397_v50, %v4039_v20  ;;  %v3239_v41 = vcombine.low %v2093_v9, %v2100_v21  ;;  %v3220_v36 = vcombine.low %v3212_v28, %v3219_v3 }
 0x121   :  { %3520 = vperm.xlu0 %3943, %v3203_v26   ;;  %v3229_v53 = vrot.slane %v3221_v30, %v4050_v32  ;;  %v3236_v39 = vrot.slane %v3222_v54, %v4050_v32  ;;  %v4628_v42 = vcombine.low %v1757_v5, %v1764_v12  ;;  %v1736_v62 = vrot.slane %v4430_v6, %v4039_v20  ;;  %v4658_v9 = vpop.xlane.xlu0 %408 }
 0x122   :  { %v4632_v40 = vcombine.low %v1715_v59, %v1722_v51  ;;  %v1799_v33 = vrot.slane %v4454_v8, %v4030_v17  ;;  %3475 = vperm.xlu1 %3944, %v2948_v58   ;;  %v2965_v43 = vcombine.low %v2957_v14, %v2964_v57  ;;  %v3255_v23 = vcombine.low %v2107_v60, %v2114_v0 }
 0x123   :  { %v2974_v34 = vrot.slane %v4506_v16, %v4050_v32  ;;  %v2981_v2 = vrot.slane %v4508_v1, %v4050_v32  ;;  %v3256_v45 = vcombine.low %v2121_v56, %v2128_v49  ;;  %v2135_v5 = vrot.slane %v400_v38, %v4030_v17  ;;  %v4666_v14 = vpop.xlane.xlu1 %411 }
 0x124   :  { %v2142_v6 = vrot.slane %v400_v38, %v4033_v18  ;;  %v2149_v46 = vrot.slane %v400_v38, %v4036_v19  ;;  %v3237_v11 = vcombine.low %v3229_v53, %v3236_v39  ;;  %v2156_v35 = vrot.slane %v400_v38, %v4039_v20 }
 0x125   :  { %3523 = vperm.xlu0 %3943, %v3220_v36   ;;  %v3246_v12 = vrot.slane %v3238_v31, %v4050_v32  ;;  %v3253_v30 = vrot.slane %v3239_v41, %v4050_v32  ;;  %v4646_v16 = vcombine.low %v1729_v55, %v1736_v62  ;;  %v1806_v1 = vrot.slane %v4454_v8, %v4033_v18 }
 0x126   :  { %v1813_v48 = vrot.slane %v4454_v8, %v4036_v19  ;;  %v1771_v7 = vrot.slane %v4456_v63, %v4030_v17  ;;  %3478 = vperm.xlu1 %3944, %v2965_v43   ;;  %v2163_v50 = vrot.slane %v403_v24, %v4030_v17  ;;  %v2170_v54 = vrot.slane %v403_v24, %v4033_v18 }
 0x127   :  { %v2177_v27 = vrot.slane %v403_v24, %v4036_v19  ;;  %v2184_v25 = vrot.slane %v403_v24, %v4039_v20  ;;  %v2982_v26 = vcombine.low %v2974_v34, %v2981_v2  ;;  %v3272_v21 = vcombine.low %v2135_v5, %v2142_v6 }
 0x128   :  { %v2991_v28 = vrot.slane %v4527_v37, %v4050_v32  ;;  %v2998_v3 = vrot.slane %v4587_v15, %v4050_v32  ;;  %v3273_v38 = vcombine.low %v2149_v46, %v2156_v35  ;;  %v3254_v59 = vcombine.low %v3246_v12, %v3253_v30 }
 0x129   :  { %3526 = vperm.xlu0 %3943, %v3237_v11   ;;  %v3263_v51 = vrot.slane %v3255_v23, %v4050_v32  ;;  %v3270_v55 = vrot.slane %v3256_v45, %v4050_v32  ;;  %v1778_v57 = vrot.slane %v4456_v63, %v4033_v18  ;;  %v1785_v60 = vrot.slane %v4456_v63, %v4036_v19 }
 0x12a   :  { %3481 = vperm.xlu1 %3944, %v2982_v26   ;;  %v2191_v37 = vrot.slane %v406_v44, %v4030_v17  ;;  %v2198_v15 = vrot.slane %v406_v44, %v4033_v18  ;;  %v3289_v0 = vcombine.low %v2163_v50, %v2170_v54  ;;  %v3290_v58 = vcombine.low %v2177_v27, %v2184_v25 }
 0x12b   :  { %v2205_v31 = vrot.slane %v406_v44, %v4036_v19  ;;  %v2212_v56 = vrot.slane %v406_v44, %v4039_v20  ;;  %v2999_v49 = vcombine.low %v2991_v28, %v2998_v3  ;;  %v3008_v41 = vrot.slane %v4514_v4, %v4050_v32 }
 0x12c   :  { %v3015_v36 = vrot.slane %v4518_v13, %v4050_v32  ;;  %v4682_v53 = vsub.s32 %v4200_v52, %v4027_v10  ;;  %v3271_v39 = vcombine.low %v3263_v51, %v3270_v55  ;;  %v3280_v62 = vrot.slane %v3272_v21, %v4050_v32 }
 0x12d   :  { %3529 = vperm.xlu0 %3943, %v3254_v59   ;;  %v3287_v43 = vrot.slane %v3273_v38, %v4050_v32  ;;  %v4688_v23 = vsub.s32 %v4211_v61, %v4027_v10  ;;  %v1792_v4 = vrot.slane %v4456_v63, %v4039_v20  ;;  %v3306_v13 = vcombine.low %v2191_v37, %v2198_v15 }
 0x12e   :  { %v3359_v24 = vpop.permute.xlu0 %3358  ;;  %3484 = vperm.xlu1 %3944, %v2999_v49   ;;  %v2219_v34 = vrot.slane %v4658_v9, %v4030_v17  ;;  %v2226_v2 = vrot.slane %v4658_v9, %v4033_v18  ;;  %v3307_v44 = vcombine.low %v2205_v31, %v2212_v56  ;;  %v2233_v45 = vrot.slane %v4658_v9, %v4036_v19 }
 0x12f   :  { %v3025_v5 = vrot.slane %v4632_v40, %v4050_v32  ;;  %v3032_v61 = vrot.slane %v4646_v16, %v4050_v32  ;;  %v3016_v63 = vcombine.low %v3008_v41, %v3015_v36  ;;  %v3554_v46 = vrot.slane %v3359_v24, %v4682_v53 }
 0x130   :  { %v4706_v35 = vsub.s32 %v4237_v22, %v4027_v10  ;;  %v2240_v12 = vrot.slane %v4658_v9, %v4039_v20  ;;  %v3288_v30 = vcombine.low %v3280_v62, %v3287_v43  ;;  %v3297_v40 = vrot.slane %v3289_v0, %v4050_v32 }
 0x131   :  { %v3362_v6 = vpop.permute.xlu1 %3361  ;;  %3532 = vperm.xlu0 %3943, %v3271_v39   ;;  %v3304_v16 = vrot.slane %v3290_v58, %v4050_v32  ;;  %v1820_v50 = vrot.slane %v4454_v8, %v4039_v20  ;;  %v3068_v54 = vcombine.low %v1799_v33, %v1806_v1  ;;  %v3051_v27 = vcombine.low %v1771_v7, %v1778_v57 }
 0x132   :  { %v3559_v11 = vrot.slane %v3362_v6, %v4688_v23  ;;  %3487 = vperm.xlu1 %3944, %v3016_v63   ;;  %v3052_v25 = vcombine.low %v1785_v60, %v1792_v4  ;;  %v3323_v26 = vcombine.low %v2219_v34, %v2226_v2  ;;  %v3033_v9 = vcombine.low %v3025_v5, %v3032_v61 }
 0x133   :  { %v3042_v21 = vrot.slane %v4610_v47, %v4050_v32  ;;  %v3049_v3 = vrot.slane %v4628_v42, %v4050_v32  ;;  %v4725_v59 = vsub.s32 %v4478_v29, %v4027_v10  ;;  %v3576_v33 = vadd.s32 4294967264, %v4200_v52 }
 0x134   :  { %v3561_v22 = vsel %vm3560_vm0, %v3559_v11, %v3554_v46  ;;  %v3324_v1 = vcombine.low %v2233_v45, %v2240_v12  ;;  %v3305_v7 = vcombine.low %v3297_v40, %v3304_v16  ;;  %v3314_v51 = vrot.slane %v3306_v13, %v4050_v32 }
 0x135   :  { %v3365_v28 = vpop.permute.xlu1 %3364  ;;  %3535 = vperm.xlu0 %3943, %v3288_v30   ;;  %v3321_v55 = vrot.slane %v3307_v44, %v4050_v32  ;;  %v3069_v47 = vcombine.low %v1813_v48, %v1820_v50  ;;  %v2247_v42 = vrot.slane %v4666_v14, %v4030_v17  ;;  %v2254_v29 = vrot.slane %v4666_v14, %v4033_v18 }
 0x136   :  { %v3566_v38 = vrot.slane %v3365_v28, %v4706_v35  ;;  %3490 = vperm.xlu1 %3944, %v3033_v9   ;;  %v2261_v60 = vrot.slane %v4666_v14, %v4036_v19  ;;  %v2268_v37 = vrot.slane %v4666_v14, %v4039_v20  ;;  %v3059_v15 = vrot.slane %v3051_v27, %v4050_v32 }
 0x137   :  { %v3066_v8 = vrot.slane %v3052_v25, %v4050_v32  ;;  %v3050_v0 = vcombine.low %v3042_v21, %v3049_v3  ;;  %v4746_v58 = vsub.s32 %v3576_v33, %v4027_v10  ;;  %v3583_v18 = vadd.s32 4294967256, %v4200_v52 }
 0x138   :  { %v3568_v57 = vsel %vm3567_vm1, %v3566_v38, %v3561_v22  ;;  %v3322_v31 = vcombine.low %v3314_v51, %v3321_v55  ;;  %v3331_v19 = vrot.slane %v3323_v26, %v4050_v32  ;;  %v3338_v56 = vrot.slane %v3324_v1, %v4050_v32 }
 0x139   :  { %v3368_v48 = vpop.permute.xlu1 %3367  ;;  %3538 = vperm.xlu0 %3943, %v3305_v7   ;;  %v3340_v20 = vcombine.low %v2247_v42, %v2254_v29  ;;  %v3341_v49 = vcombine.low %v2261_v60, %v2268_v37  ;;  %v3067_v41 = vcombine.low %v3059_v15, %v3066_v8  ;;  %v3076_v36 = vrot.slane %v3068_v54, %v4050_v32 }
 0x13a   :  { %v3573_v17 = vrot.slane %v3368_v48, %v4725_v59  ;;  %3493 = vperm.xlu1 %3944, %v3050_v0   ;;  %v3083_v24 = vrot.slane %v3069_v47, %v4050_v32  ;;  %v4756_v4 = vsub.s32 %v3583_v18, %v4027_v10  ;;  %v3590_v13 = vadd.s32 4294967248, %v4200_v52 }
 0x13b   :  { %v3339_v34 = vcombine.low %v3331_v19, %v3338_v56  ;;  %v3348_v44 = vrot.slane %v3340_v20, %v4050_v32  ;;  %v3355_v45 = vrot.slane %v3341_v49, %v4050_v32  ;;  %v3597_v46 = vadd.s32 4294967240, %v4200_v52 }
 0x13c   :  { %v3575_v14 = vsel %vm3574_vm2, %v3573_v17, %v3568_v57  ;;  %v3084_v61 = vcombine.low %v3076_v36, %v3083_v24  ;;  %v4764_v63 = vsub.s32 %v3590_v13, %v4027_v10  ;;  %v3604_v54 = vadd.s32 4294967232, %v4200_v52 }
 0x13d   :  { %v3371_v39 = vpop.permute.xlu1 %3370  ;;  %3541 = vperm.xlu0 %3943, %v3322_v31   ;;  %v3356_v30 = vcombine.low %v3348_v44, %v3355_v45  ;;  %v4770_v50 = vsub.s32 %v3597_v46, %v4027_v10  ;;  %v3611_v27 = vadd.s32 4294967224, %v4200_v52  ;;  %v4002_v25 = vmov 0.0  }
 0x13e   :  { %v3580_v62 = vrot.slane %v3371_v39, %v4746_v58  ;;  %v3386_v43 = vpop.permute.xlu0 %3385  ;;  %3496 = vperm.xlu1 %3944, %v3067_v41   ;;  %27 = vst [vmem:[#allocation2] sm:$0xf] %v4002_v25  ;;  %v4777_v28 = vsub.s32 %v3604_v54, %v4027_v10  ;;  %v3618_v3 = vadd.s32 4294967216, %v4200_v52  ;;  %v3625_v33 = vadd.s32 4294967208, %v4200_v52 }
 0x13f   :  { %v4781_v38 = vsub.s32 %v3611_v27, %v4027_v10  ;;  %v3632_v60 = vadd.s32 4294967200, %v4200_v52  ;;  %v3639_v37 = vadd.s32 4294967192, %v4200_v52  ;;  %v3646_v20 = vadd.s32 4294967184, %v4200_v52 }
 0x140   :  { %v3582_v2 = vsel %vm3581_vm3, %v3580_v62, %v3575_v14  ;;  %v4787_v55 = vsub.s32 %v3618_v3, %v4027_v10  ;;  %v4791_v42 = vsub.s32 %v3625_v33, %v4027_v10  ;;  %v3653_v14 = vadd.s32 4294967176, %v4200_v52 }
 0x141   :  { %v3374_v5 = vpop.permute.xlu1 %3373  ;;  %3544 = vperm.xlu0 %3943, %v3339_v34   ;;  %v3615_v47 = vrot.slane %v3386_v43, %v4781_v38  ;;  %v4801_v18 = vsub.s32 %v3632_v60, %v4027_v10  ;;  %v4804_v31 = vsub.s32 %v3639_v37, %v4027_v10  ;;  %v4813_v24 = vsub.s32 %v3646_v20, %v4027_v10 }
 0x142   :  { %v3587_v6 = vrot.slane %v3374_v5, %v4756_v4  ;;  %3499 = vperm.xlu1 %3944, %v3084_v61   ;;  %v3392_v12 = vpop.permute.xlu0 %3391  ;;  %v4816_v62 = vsub.s32 %v3653_v14, %v4027_v10 }
 0x143   :  { %v3629_v0 = vrot.slane %v3392_v12, %v4791_v42 }
 0x144   :  { %v3589_v11 = vsel %vm3588_vm4, %v3587_v6, %v3582_v2 }
 0x145   :  { %v3377_v40 = vpop.permute.xlu1 %3376  ;;  %3547 = vperm.xlu0 %3943, %v3356_v30  }
 0x146   :  { %v3594_v16 = vrot.slane %v3377_v40, %v4764_v63  ;;  %v3398_v9 = vpop.permute.xlu0 %3397 }
 0x147   :  { %v3643_v36 = vrot.slane %v3398_v9, %v4804_v31 }
 0x148   :  { %v3596_v22 = vsel %vm3595_vm5, %v3594_v16, %v3589_v11 }
 0x149   :  { %v3380_v26 = vpop.permute.xlu1 %3379 }
 0x14a   :  { %v3601_v21 = vrot.slane %v3380_v26, %v4770_v50  ;;  %v3404_v29 = vpop.permute.xlu0 %3403 }
 0x14b   :  { %v3657_v2 = vrot.slane %v3404_v29, %v4816_v62 }
 0x14c   :  { %v3603_v1 = vsel %vm3602_vm6, %v3601_v21, %v3596_v22 }
 0x14d   :  { %v3383_v7 = vpop.permute.xlu1 %3382 }
 0x14e   :  { %v3608_v51 = vrot.slane %v3383_v7, %v4777_v28  ;;  %v3410_v56 = vpop.permute.xlu0 %3409 }
 0x14f   :  { %v3667_v10 = vrot.slane %v3410_v56, %v4688_v23 }
 0x150   :  { %v3610_v57 = vsel %vm3609_vm7, %v3608_v51, %v3603_v1 }
 0x151   :  { %v3389_v15 = vpop.permute.xlu1 %3388  ;;  %v3617_v8 = vsel %vm3616_vm8, %v3615_v47, %v3610_v57 }
 0x152   :  { %v3622_v48 = vrot.slane %v3389_v15, %v4787_v55  ;;  %v3416_v13 = vpop.permute.xlu0 %3415 }
 0x153   :  { %v3677_v40 = vrot.slane %v3416_v13, %v4725_v59 }
 0x154   :  { %v3624_v17 = vsel %vm3623_vm9, %v3622_v48, %v3617_v8 }
 0x155   :  { %v3631_v19 = vsel %vm3630_vm10, %v3629_v0, %v3624_v17  ;;  %v3395_v49 = vpop.permute.xlu1 %3394 }
 0x156   :  { %v3636_v41 = vrot.slane %v3395_v49, %v4801_v18  ;;  %v3422_v5 = vpop.permute.xlu0 %3421 }
 0x157   :  { %v3687_v25 = vrot.slane %v3422_v5, %v4756_v4 }
 0x158   :  { %v3638_v39 = vsel %vm3637_vm11, %v3636_v41, %v3631_v19 }
 0x159   :  { %v3645_v43 = vsel %vm3644_vm12, %v3643_v36, %v3638_v39  ;;  %v3401_v52 = vpop.permute.xlu1 %3400 }
 0x15a   :  { %v3650_v34 = vrot.slane %v3401_v52, %v4813_v24  ;;  %v3428_v12 = vpop.permute.xlu0 %3427 }
 0x15b   :  { %v3697_v1 = vrot.slane %v3428_v12, %v4770_v50 }
 0x15c   :  { %v3652_v44 = vsel %vm3651_vm13, %v3650_v34, %v3645_v43 }
 0x15d   :  { %v4823_v45 = vsel %vm3658_vm14, %v3657_v2, %v3652_v44 }
 0x15e   :  { %v3434_v26 = vpop.permute.xlu0 %3433 }
 0x15f   :  { %v3407_v61 = vpop.permute.xlu1 %3406  ;;  %v3707_v60 = vrot.slane %v3434_v26, %v4781_v38 }
 0x160   :  { %v3663_v6 = vrot.slane %v3407_v61, %v4682_v53 }
 0x162   :  { %v3668_v46 = vsel %vm3560_vm0, %v3667_v10, %v3663_v6 }
 0x164   :  { %v3440_v7 = vpop.permute.xlu0 %3439 }
 0x165   :  { %v3413_v11 = vpop.permute.xlu1 %3412  ;;  %v3717_v17 = vrot.slane %v3440_v7, %v4791_v42 }
 0x166   :  { %v3672_v30 = vrot.slane %v3413_v11, %v4706_v35 }
 0x168   :  { %v3673_v16 = vsel %vm3567_vm1, %v3672_v30, %v3668_v46 }
 0x169   :  { %v3678_v54 = vsel %vm3574_vm2, %v3677_v40, %v3673_v16  ;;  %v3446_v8 = vpop.permute.xlu0 %3445 }
 0x16a   :  { %v3419_v27 = vpop.permute.xlu1 %3418  ;;  %v3727_v41 = vrot.slane %v3446_v8, %v4804_v31 }
 0x16b   :  { %v3682_v22 = vrot.slane %v3419_v27, %v4746_v58 }
 0x16d   :  { %v3683_v9 = vsel %vm3581_vm3, %v3682_v22, %v3678_v54 }
 0x16e   :  { %v3688_v21 = vsel %vm3588_vm4, %v3687_v25, %v3683_v9  ;;  %v3452_v14 = vpop.permute.xlu0 %3451 }
 0x16f   :  { %v3425_v3 = vpop.permute.xlu1 %3424  ;;  %v3737_v52 = vrot.slane %v3452_v14, %v4816_v62 }
 0x170   :  { %v3692_v33 = vrot.slane %v3425_v3, %v4764_v63 }
 0x172   :  { %v3693_v51 = vsel %vm3595_vm5, %v3692_v33, %v3688_v21 }
 0x173   :  { %v3431_v47 = vpop.permute.xlu1 %3430  ;;  %v3698_v29 = vsel %vm3602_vm6, %v3697_v1, %v3693_v51 }
 0x174   :  { %v3702_v57 = vrot.slane %v3431_v47, %v4777_v28  ;;  %v3458_v34 = vpop.permute.xlu0 %3457 }
 0x176   :  { %v3703_v37 = vsel %vm3609_vm7, %v3702_v57, %v3698_v29  ;;  %v3746_v29 = vrot.slane %v3458_v34, %v4688_v23 }
 0x177   :  { %v3708_v15 = vsel %vm3616_vm8, %v3707_v60, %v3703_v37 }
 0x178   :  { %v3437_v48 = vpop.permute.xlu1 %3436 }
 0x179   :  { %v3712_v0 = vrot.slane %v3437_v48, %v4787_v55  ;;  %v3464_v10 = vpop.permute.xlu0 %3463 }
 0x17b   :  { %v3713_v19 = vsel %vm3623_vm9, %v3712_v0, %v3708_v15 }
 0x17c   :  { %v3718_v56 = vsel %vm3630_vm10, %v3717_v17, %v3713_v19  ;;  %v3756_v19 = vrot.slane %v3464_v10, %v4725_v59 }
 0x17d   :  { %v3443_v20 = vpop.permute.xlu1 %3442  ;;  %v3470_v46 = vpop.permute.xlu0 %3469 }
 0x17e   :  { %v3722_v49 = vrot.slane %v3443_v20, %v4801_v18 }
 0x180   :  { %v3723_v36 = vsel %vm3637_vm11, %v3722_v49, %v3718_v56 }
 0x181   :  { %v3449_v39 = vpop.permute.xlu1 %3448  ;;  %v3728_v43 = vsel %vm3644_vm12, %v3727_v41, %v3723_v36 }
 0x182   :  { %v3732_v13 = vrot.slane %v3449_v39, %v4813_v24  ;;  %v3766_v39 = vrot.slane %v3470_v46, %v4756_v4 }
 0x184   :  { %v3733_v2 = vsel %vm3651_vm13, %v3732_v13, %v3728_v43 }
 0x185   :  { %v4856_v44 = vsel %vm3658_vm14, %v3737_v52, %v3733_v2  ;;  %v3455_v5 = vpop.permute.xlu1 %3454 }
 0x186   :  { %v3742_v7 = vrot.slane %v3455_v5, %v4682_v53 }
 0x188   :  { %v3747_v8 = vsel %vm3560_vm0, %v3746_v29, %v3742_v7 }
 0x189   :  { %v3461_v61 = vpop.permute.xlu1 %3460 }
 0x18a   :  { %v3751_v51 = vrot.slane %v3461_v61, %v4706_v35 }
 0x18c   :  { %v3752_v48 = vsel %vm3567_vm1, %v3751_v51, %v3747_v8 }
 0x18d   :  { %v3467_v6 = vpop.permute.xlu1 %3466 }
 0x18e   :  { %v3761_v0 = vrot.slane %v3467_v6, %v4746_v58 }
 0x191   :  { %v3473_v11 = vpop.permute.xlu1 %3472 }
 0x192   :  { %v3771_v41 = vrot.slane %v3473_v11, %v4764_v63 }
 0x194   :  { %v3503_v12 = vpop.permute.xlu0 %3502 }
 0x195   :  { %v3506_v30 = vpop.permute.xlu1 %3505  ;;  %v3821_v60 = vrot.slane %v3503_v12, %v4682_v53 }
 0x196   :  { %v3825_v57 = vrot.slane %v3506_v30, %v4688_v23 }
 0x198   :  { %v3509_v40 = vpop.permute.xlu0 %3508  ;;  %v3826_v56 = vsel %vm3560_vm0, %v3825_v57, %v3821_v60 }
 0x199   :  { %v3512_v16 = vpop.permute.xlu1 %3511  ;;  %v3830_v15 = vrot.slane %v3509_v40, %v4706_v35  ;;  %v3757_v35 = vsel %vm3574_vm2, %v3756_v19, %v3752_v48 }
 0x19a   :  { %v3835_v20 = vrot.slane %v3512_v16, %v4725_v59  ;;  %v3762_v49 = vsel %vm3581_vm3, %v3761_v0, %v3757_v35 }
 0x19b   :  { %v3831_v23 = vsel %vm3567_vm1, %v3830_v15, %v3826_v56  ;;  %v3767_v5 = vsel %vm3588_vm4, %v3766_v39, %v3762_v49 }
 0x19c   :  { %v3515_v54 = vpop.permute.xlu0 %3514  ;;  %v3836_v13 = vsel %vm3574_vm2, %v3835_v20, %v3831_v23  ;;  %v3772_v6 = vsel %vm3595_vm5, %v3771_v41, %v3767_v5  ;;  %v28_v23 = vld [vmem:[#allocation2] sm:$0xf] }
 0x19d   :  { %v3518_v27 = vpop.permute.xlu1 %3517  ;;  %v3840_v53 = vrot.slane %v3515_v54, %v4746_v58 }
 0x19e   :  { %v3845_v43 = vrot.slane %v3518_v27, %v4756_v4 }
 0x19f   :  { %v3841_v34 = vsel %vm3581_vm3, %v3840_v53, %v3836_v13 }
 0x1a0   :  { %v3521_v22 = vpop.permute.xlu0 %3520  ;;  %v3846_v30 = vsel %vm3588_vm4, %v3845_v43, %v3841_v34 }
 0x1a1   :  { %v3476_v25 = vpop.permute.xlu1 %3475  ;;  %v3850_v58 = vrot.slane %v3521_v22, %v4764_v63 }
 0x1a2   :  { %v3776_v59 = vrot.slane %v3476_v25, %v4770_v50 }
 0x1a4   :  { %v3524_v26 = vpop.permute.xlu0 %3523  ;;  %v3777_v12 = vsel %vm3602_vm6, %v3776_v59, %v3772_v6 }
 0x1a5   :  { %v3479_v9 = vpop.permute.xlu1 %3478  ;;  %v3855_v61 = vrot.slane %v3524_v26, %v4770_v50  ;;  %v3851_v50 = vsel %vm3595_vm5, %v3850_v58, %v3846_v30 }
 0x1a6   :  { %v3781_v2 = vrot.slane %v3479_v9, %v4777_v28 }
 0x1a7   :  { %v3856_v22 = vsel %vm3602_vm6, %v3855_v61, %v3851_v50 }
 0x1a8   :  { %v3527_v21 = vpop.permute.xlu0 %3526  ;;  %v3782_v54 = vsel %vm3609_vm7, %v3781_v2, %v3777_v12 }
 0x1a9   :  { %v3482_v3 = vpop.permute.xlu1 %3481  ;;  %v3860_v4 = vrot.slane %v3527_v21, %v4777_v28 }
 0x1aa   :  { %v3786_v10 = vrot.slane %v3482_v3, %v4781_v38 }
 0x1ac   :  { %v3530_v33 = vpop.permute.xlu0 %3529  ;;  %v3787_v25 = vsel %vm3616_vm8, %v3786_v10, %v3782_v54 }
 0x1ad   :  { %v3485_v1 = vpop.permute.xlu1 %3484  ;;  %v3865_v63 = vrot.slane %v3530_v33, %v4781_v38  ;;  %v3861_v38 = vsel %vm3609_vm7, %v3860_v4, %v3856_v22 }
 0x1ae   :  { %v3791_v46 = vrot.slane %v3485_v1, %v4787_v55 }
 0x1b0   :  { %v3533_v47 = vpop.permute.xlu0 %3532  ;;  %v3792_v21 = vsel %vm3623_vm9, %v3791_v46, %v3787_v25 }
 0x1b1   :  { %v3488_v37 = vpop.permute.xlu1 %3487  ;;  %v3870_v27 = vrot.slane %v3533_v47, %v4787_v55  ;;  %v3866_v55 = vsel %vm3616_vm8, %v3865_v63, %v3861_v38 }
 0x1b2   :  { %v3796_v40 = vrot.slane %v3488_v37, %v4791_v42 }
 0x1b4   :  { %v3536_v17 = vpop.permute.xlu0 %3535  ;;  %v3797_v7 = vsel %vm3630_vm10, %v3796_v40, %v3792_v21 }
 0x1b5   :  { %v3491_v14 = vpop.permute.xlu1 %3490  ;;  %v3875_v26 = vrot.slane %v3536_v17, %v4791_v42  ;;  %v3871_v42 = vsel %vm3623_vm9, %v3870_v27, %v3866_v55 }
 0x1b6   :  { %v3801_v28 = vrot.slane %v3491_v14, %v4801_v18 }
 0x1b8   :  { %v3539_v36 = vpop.permute.xlu0 %3538  ;;  %v3802_v29 = vsel %vm3637_vm11, %v3801_v28, %v3797_v7 }
 0x1b9   :  { %v3494_v52 = vpop.permute.xlu1 %3493  ;;  %v3880_v3 = vrot.slane %v3539_v36, %v4801_v18  ;;  %v3876_v18 = vsel %vm3630_vm10, %v3875_v26, %v3871_v42 }
 0x1ba   :  { %v3806_v9 = vrot.slane %v3494_v52, %v4804_v31 }
 0x1bb   :  { %v3881_v15 = vsel %vm3637_vm11, %v3880_v3, %v3876_v18 }
 0x1bc   :  { %v3542_v11 = vpop.permute.xlu0 %3541  ;;  %v3807_v37 = vsel %vm3644_vm12, %v3806_v9, %v3802_v29 }
 0x1bd   :  { %v3497_v16 = vpop.permute.xlu1 %3496  ;;  %v3885_v51 = vrot.slane %v3542_v11, %v4804_v31 }
 0x1be   :  { %v3811_v33 = vrot.slane %v3497_v16, %v4813_v24 }
 0x1bf   :  { %v3886_v31 = vsel %vm3644_vm12, %v3885_v51, %v3881_v15 }
 0x1c0   :  { %v3545_v1 = vpop.permute.xlu0 %3544  ;;  %v3812_v8 = vsel %vm3651_vm13, %v3811_v33, %v3807_v37 }
 0x1c1   :  { %v3500_v47 = vpop.permute.xlu1 %3499  ;;  %v3890_v60 = vrot.slane %v3545_v1, %v4813_v24 }
 0x1c2   :  { %v3816_v57 = vrot.slane %v3500_v47, %v4816_v62 }
 0x1c3   :  { %v3891_v19 = vsel %vm3651_vm13, %v3890_v60, %v3886_v31 }
 0x1c4   :  { %v3548_v48 = vpop.permute.xlu0 %3547  ;;  %v3817_v0 = vsel %vm3658_vm14, %v3816_v57, %v3812_v8 }
 0x1c5   :  { %v3895_v17 = vrot.slane %v3548_v48, %v4816_v62  ;;  %v3898_v56 = vsel %vm3897_vm15, %v3817_v0, %v4823_v45 }
 0x1c7   :  { %v3896_v24 = vsel %vm3658_vm14, %v3895_v17, %v3891_v19 }
 0x1c8   :  { %v3899_v20 = vsel %vm3897_vm15, %v3896_v24, %v4856_v44 }
 0x1c9   :  { %v3900_v14 = vcombine.low %v3898_v56, %v3899_v20 }
 0x1cb   :  { %v3907_v53 = vrot.slane %v3900_v14, %v4050_v32 }
 0x1cd   :  { %v3909_v35 = vadd.f32 %v3907_v53, %v28_v23 }
 0x1cf   :  { %3910 = vst [vmem:[#allocation2] sm:$0xf] %v3909_v35 }
 0x1d6   :  { %v3914_v49 = vld [vmem:[#allocation2] sm:$0xf] }
 0x1d7   :  { %v3915_v41 = vmul.f32 0.00390625, %v3914_v49 }
 0x1d9   :  { %3916 = vst [vmem:[#allocation6] sm:$0xf] %v3915_v41 }
 0x1da   :  { %3978 = shalt.err (!%p3975_p12)
}
 0x1db   :  { %s3979_s24 = scalar_lea.hbm %s4936_s1, 64 }
 0x1dc   :  { %p3980_p13 = scmp.ne.s32.totalorder %s4936_s1, %s3979_s24  ;;  %p3983_p0 = scmp.lt.u32.totalorder %s3979_s24, %s4936_s1 }
 0x1de   :  { %p3985_p1 = pnand %p3983_p0, %p3980_p13 }
 0x1e0   :  { %3988 = shalt.err (!%p3985_p1)
}
 0x1e1   :  { %3926 = dma.vmem_to_hbm [thread:$0]  %s3924_s20, 64, %s4936_s1, [#allocation5]  }
 0x1e2   :  { %3991 = dma.done.wait [#allocation5], 64  }
 0x1e3   :  { %3992 = vsyncadd [#allocation5], 4294967232 }
 0x1e4   :  { %3930 = vsyncpa [#allocation4], 1 }
 0x1e5   :  { %3931 = vsyncpa [#allocation5], 1 }

</bundles_post_ra>
